<compile_context>
chip_gen: v5e
topology: v5e:2x2
jax: 0.10.0
libtpu: 0.0.40
codegen_flags: <defaults>
</compile_context>

<pallas_src>
import functools

import jax
import jax.numpy as jnp
import numpy as np
from jax.experimental import pallas as pl
from jax.experimental.pallas import tpu as pltpu

# Same dimension numbers the official TPU flash-attention kernel uses for
# A @ B^T (contract the last dim of both operands).
_TRANS_B_DIM_NUMBERS = (((1,), (1,)), ((), ()))


def _conv_relu_kernel(x_ref, w_ref, b_ref, o_ref, xp_ref, *,
                      kh_sz, kw_sz, pad, use_bf16_mxu):
    # x_ref:  (1, H, W, Cin)       one image, NHWC, unpadded
    # w_ref:  (Cout, KH*KW*Cin)    folded filter matrix (row = output channel)
    # b_ref:  (Cout, 1)            bias column vector
    # o_ref:  (1, Cout, H*W)       output, channel-major, lane-dense (H*W lanes)
    # xp_ref: (Hp, Wp, Cin)        VMEM scratch for the zero-padded image
    _, H, W, Cin = x_ref.shape
    Cout = b_ref.shape[0]

    # In-kernel "same" zero padding (avoids a wrapper-side jnp.pad HBM pass).
    xp_ref[...] = jnp.zeros_like(xp_ref)
    xp_ref[pad:pad + H, pad:pad + W, :] = x_ref[0]

    # im2col: one (H*W, KH*KW*Cin) patch matrix so the whole conv is a single
    # MXU matmul with a deep contraction instead of KH*KW tiny K=Cin matmuls.
    cols = []
    for kh in range(kh_sz):
        for kw in range(kw_sz):
            cols.append(xp_ref[kh:kh + H, kw:kw + W, :].reshape(H * W, Cin))
    patch = jnp.concatenate(cols, axis=1)            # (H*W, KH*KW*Cin)

    w = w_ref[...]                                   # (Cout, KH*KW*Cin)
    if use_bf16_mxu:                                 # ~2x MXU peak on v6e/v7x
        patch = patch.astype(jnp.bfloat16)
        w = w.astype(jnp.bfloat16)

    # (Cout, H*W) = W_folded @ patch^T  -- single matmul, f32 accumulation.
    acc_t = jax.lax.dot_general(
        w, patch, dimension_numbers=_TRANS_B_DIM_NUMBERS,
        preferred_element_type=jnp.float32)

    out = jnp.maximum(acc_t + b_ref[...], 0.0)       # bias + ReLU in f32
    o_ref[0] = out.astype(o_ref.dtype)               # lane-dense store (H*W lanes)


def conv_bn_relu(x_nchw, weight_oihw, bias, filter_sz=3, use_bf16_mxu=False):
    """Forward pass of CONV_BN_RELU (Conv2d 'same' + ReLU).

    x_nchw:      (N, Cin, H, W)   float32
    weight_oihw: (Cout, Cin, KH, KW)
    bias:        (Cout,)
    returns      (N, Cout, H, W)  float32
    """
    N, Cin, H, W = x_nchw.shape
    Cout, Cin_w, KH, KW = weight_oihw.shape
    assert Cin_w == Cin and KH == filter_sz and KW == filter_sz
    # PyTorch pad=(filter_sz-1)//2 is only true "same" for odd filter sizes.
    assert filter_sz % 2 == 1, "CONV_BN_RELU 'same' padding requires odd filter_sz"
    pad = (filter_sz - 1) // 2
    Hp, Wp = H + 2 * pad, W + 2 * pad

    # NCHW -> NHWC so Cin rides the lane axis for the im2col patch.
    # TODO(synk): fold this input transpose into the kernel too (needs an
    # in-kernel 3-D relayout); the output-side transpose is already fused.
    x_nhwc = jnp.transpose(x_nchw, (0, 2, 3, 1))

    # OIHW -> (Cout, KH*KW*Cin); column order (kh, kw, ci) matches the patch.
    w_mat = jnp.transpose(weight_oihw, (0, 2, 3, 1)).reshape(Cout, KH * KW * Cin)
    b_col = bias.reshape(Cout, 1)

    kernel = functools.partial(
        _conv_relu_kernel, kh_sz=KH, kw_sz=KW, pad=pad,
        use_bf16_mxu=use_bf16_mxu)

    out_flat = pl.pallas_call(
        kernel,
        out_shape=jax.ShapeDtypeStruct((N, Cout, H * W), x_nchw.dtype),
        grid_spec=pltpu.PrefetchScalarGridSpec(
            num_scalar_prefetch=0,
            grid=(N,),
            in_specs=[
                pl.BlockSpec((1, H, W, Cin), lambda n: (n, 0, 0, 0)),
                pl.BlockSpec((Cout, KH * KW * Cin), lambda n: (0, 0)),
                pl.BlockSpec((Cout, 1), lambda n: (0, 0)),
            ],
            out_specs=pl.BlockSpec((1, Cout, H * W), lambda n: (n, 0, 0)),
            scratch_shapes=[pltpu.VMEM((Hp, Wp, Cin), jnp.float32)],
        ),
        compiler_params=pltpu.CompilerParams(
            dimension_semantics=("parallel",),
            vmem_limit_bytes=32 * 1024 * 1024),
    )(x_nhwc, w_mat, b_col)

    # (N, Cout, H*W) is already channel-major: pure metadata reshape to NCHW.
    return out_flat.reshape(N, Cout, H, W)


if __name__ == "__main__":
    N, Cin, Cout, H, W, K = 2, 4, 8, 16, 16, 3

    key = jax.random.PRNGKey(0)
    kx, kw, kb = jax.random.split(key, 3)
    x = jax.random.normal(kx, (N, Cin, H, W), dtype=jnp.float32)
    weight = jax.random.normal(kw, (Cout, Cin, K, K), dtype=jnp.float32) * 0.1
    bias = jax.random.normal(kb, (Cout,), dtype=jnp.float32) * 0.1

    out = jax.block_until_ready(conv_bn_relu(x, weight, bias, filter_sz=K))

    # Reference check: XLA conv (same semantics as nn.Conv2d 'same') + ReLU.
    ref = jax.lax.conv_general_dilated(
        x, weight, window_strides=(1, 1), padding="SAME",
        dimension_numbers=("NCHW", "OIHW", "NCHW"))
    ref = jnp.maximum(ref + bias[None, :, None, None], 0.0)
    ref = jax.block_until_ready(ref)

    assert out.shape == (N, Cout, H, W)
    assert np.allclose(np.asarray(out), np.asarray(ref), atol=1e-4, rtol=1e-4)
    print("KERNEL_OK")
</pallas_src>

<mosaic_0001>
module attributes {stable_mosaic.version = 11 : i64} {
  func.func @_conv_relu_kernel(%arg0: i32, %arg1: memref<1x16x16x4xf32, #tpu.memory_space<vmem>>, %arg2: memref<8x36xf32, #tpu.memory_space<vmem>>, %arg3: memref<8x1xf32, #tpu.memory_space<vmem>>, %arg4: memref<1x8x256xf32, #tpu.memory_space<vmem>>, %arg5: memref<18x18x4xf32, #tpu.memory_space<vmem>>) attributes {dimension_semantics = [#tpu.dimension_semantics<parallel>], iteration_bounds = array<i64: 2>, scalar_prefetch = 0 : i64, scratch_operands = 1 : i64, tpu.core_type = #tpu.core_type<tc>, window_params = [{transform_indices = @transform_0, window_bounds = array<i64: 1, 16, 16, 4>}, {pipeline_mode = #tpu.pipeline_mode<synchronous>, transform_indices = @transform_1, window_bounds = array<i64: 8, 36>}, {pipeline_mode = #tpu.pipeline_mode<synchronous>, transform_indices = @transform_2, window_bounds = array<i64: 8, 1>}, {transform_indices = @transform_3, window_bounds = array<i64: 1, 8, 256>}]} {
    %cst = arith.constant 0.000000e+00 : f32
    %0 = vector.broadcast %cst : f32 to vector<18x18x4xf32>
    %c0 = arith.constant 0 : index
    %c0_0 = arith.constant 0 : index
    %c0_1 = arith.constant 0 : index
    %1 = vector.load %arg5[%c0, %c0_0, %c0_1] : memref<18x18x4xf32, #tpu.memory_space<vmem>>, vector<18x18x4xf32>
    tpu.vector_store %arg5[%c0, %c0_0, %c0_1], %0 {strides = array<i32>} : memref<18x18x4xf32, #tpu.memory_space<vmem>>, vector<18x18x4xf32>,
    %c0_2 = arith.constant 0 : index
    %c0_3 = arith.constant 0 : index
    %c0_4 = arith.constant 0 : index
    %c0_5 = arith.constant 0 : index
    %2 = vector.load %arg1[%c0_2, %c0_3, %c0_4, %c0_5] : memref<1x16x16x4xf32, #tpu.memory_space<vmem>>, vector<1x16x16x4xf32>
    %3 = vector.shape_cast %2 : vector<1x16x16x4xf32> to vector<16x16x4xf32>
    %c1 = arith.constant 1 : index
    %c1_6 = arith.constant 1 : index
    %c0_7 = arith.constant 0 : index
    %4 = vector.load %arg5[%c1, %c1_6, %c0_7] : memref<18x18x4xf32, #tpu.memory_space<vmem>>, vector<16x16x4xf32>
    tpu.vector_store %arg5[%c1, %c1_6, %c0_7], %3 {strides = array<i32>} : memref<18x18x4xf32, #tpu.memory_space<vmem>>, vector<16x16x4xf32>,
    %c0_8 = arith.constant 0 : index
    %c0_9 = arith.constant 0 : index
    %c0_10 = arith.constant 0 : index
    %5 = vector.load %arg5[%c0_8, %c0_9, %c0_10] : memref<18x18x4xf32, #tpu.memory_space<vmem>>, vector<16x16x4xf32>
    %6 = vector.shape_cast %5 : vector<16x16x4xf32> to vector<256x4xf32>
    %c0_11 = arith.constant 0 : index
    %c1_12 = arith.constant 1 : index
    %c0_13 = arith.constant 0 : index
    %7 = vector.load %arg5[%c0_11, %c1_12, %c0_13] : memref<18x18x4xf32, #tpu.memory_space<vmem>>, vector<16x16x4xf32>
    %8 = vector.shape_cast %7 : vector<16x16x4xf32> to vector<256x4xf32>
    %c0_14 = arith.constant 0 : index
    %c2 = arith.constant 2 : index
    %c0_15 = arith.constant 0 : index
    %9 = vector.load %arg5[%c0_14, %c2, %c0_15] : memref<18x18x4xf32, #tpu.memory_space<vmem>>, vector<16x16x4xf32>
    %10 = vector.shape_cast %9 : vector<16x16x4xf32> to vector<256x4xf32>
    %c1_16 = arith.constant 1 : index
    %c0_17 = arith.constant 0 : index
    %c0_18 = arith.constant 0 : index
    %11 = vector.load %arg5[%c1_16, %c0_17, %c0_18] : memref<18x18x4xf32, #tpu.memory_space<vmem>>, vector<16x16x4xf32>
    %12 = vector.shape_cast %11 : vector<16x16x4xf32> to vector<256x4xf32>
    %c1_19 = arith.constant 1 : index
    %c1_20 = arith.constant 1 : index
    %c0_21 = arith.constant 0 : index
    %13 = vector.load %arg5[%c1_19, %c1_20, %c0_21] : memref<18x18x4xf32, #tpu.memory_space<vmem>>, vector<16x16x4xf32>
    %14 = vector.shape_cast %13 : vector<16x16x4xf32> to vector<256x4xf32>
    %c1_22 = arith.constant 1 : index
    %c2_23 = arith.constant 2 : index
    %c0_24 = arith.constant 0 : index
    %15 = vector.load %arg5[%c1_22, %c2_23, %c0_24] : memref<18x18x4xf32, #tpu.memory_space<vmem>>, vector<16x16x4xf32>
    %16 = vector.shape_cast %15 : vector<16x16x4xf32> to vector<256x4xf32>
    %c2_25 = arith.constant 2 : index
    %c0_26 = arith.constant 0 : index
    %c0_27 = arith.constant 0 : index
    %17 = vector.load %arg5[%c2_25, %c0_26, %c0_27] : memref<18x18x4xf32, #tpu.memory_space<vmem>>, vector<16x16x4xf32>
    %18 = vector.shape_cast %17 : vector<16x16x4xf32> to vector<256x4xf32>
    %c2_28 = arith.constant 2 : index
    %c1_29 = arith.constant 1 : index
    %c0_30 = arith.constant 0 : index
    %19 = vector.load %arg5[%c2_28, %c1_29, %c0_30] : memref<18x18x4xf32, #tpu.memory_space<vmem>>, vector<16x16x4xf32>
    %20 = vector.shape_cast %19 : vector<16x16x4xf32> to vector<256x4xf32>
    %c2_31 = arith.constant 2 : index
    %c2_32 = arith.constant 2 : index
    %c0_33 = arith.constant 0 : index
    %21 = vector.load %arg5[%c2_31, %c2_32, %c0_33] : memref<18x18x4xf32, #tpu.memory_space<vmem>>, vector<16x16x4xf32>
    %22 = vector.shape_cast %21 : vector<16x16x4xf32> to vector<256x4xf32>
    %23 = tpu.concatenate %6, %8, %10, %12, %14, %16, %18, %20, %22 in 1 : vector<256x4xf32>, vector<256x4xf32>, vector<256x4xf32>, vector<256x4xf32>, vector<256x4xf32>, vector<256x4xf32>, vector<256x4xf32>, vector<256x4xf32>, vector<256x4xf32> -> vector<256x36xf32>
    %c0_34 = arith.constant 0 : index
    %c0_35 = arith.constant 0 : index
    %24 = vector.load %arg2[%c0_34, %c0_35] : memref<8x36xf32, #tpu.memory_space<vmem>>, vector<8x36xf32>
    %cst_36 = arith.constant dense<0.000000e+00> : vector<8x256xf32>
    %25 = tpu.matmul %24, %23, %cst_36 {dimension_numbers = #tpu.dot_dimension_numbers<[1], [1], [0], [0], [0, 0, 1, 0], [], []>} : vector<8x36xf32>, vector<256x36xf32>, vector<8x256xf32> -> vector<8x256xf32>
    %c0_37 = arith.constant 0 : index
    %c0_38 = arith.constant 0 : index
    %26 = vector.load %arg3[%c0_37, %c0_38] : memref<8x1xf32, #tpu.memory_space<vmem>>, vector<8x1xf32>
    %27 = vector.broadcast %26 : vector<8x1xf32> to vector<8x256xf32>
    %28 = arith.addf %25, %27 : vector<8x256xf32>
    %cst_39 = arith.constant 0.000000e+00 : f32
    %29 = vector.broadcast %cst_39 : f32 to vector<8x256xf32>
    %30 = arith.maximumf %28, %29 : vector<8x256xf32>
    %c0_40 = arith.constant 0 : index
    %c0_41 = arith.constant 0 : index
    %c0_42 = arith.constant 0 : index
    %31 = vector.load %arg4[%c0_40, %c0_41, %c0_42] : memref<1x8x256xf32, #tpu.memory_space<vmem>>, vector<1x8x256xf32>
    %32 = vector.shape_cast %31 : vector<1x8x256xf32> to vector<8x256xf32>
    %33 = vector.shape_cast %30 : vector<8x256xf32> to vector<1x8x256xf32>
    tpu.vector_store %arg4[%c0_40, %c0_41, %c0_42], %33 {strides = array<i32>} : memref<1x8x256xf32, #tpu.memory_space<vmem>>, vector<1x8x256xf32>,
    return
  }
  func.func @transform_0(%arg0: i32) -> (i32, i32, i32, i32) {
    %c0_i32 = arith.constant 0 : i32
    %c0_i32_0 = arith.constant 0 : i32
    %c0_i32_1 = arith.constant 0 : i32
    %c0_i32_2 = arith.constant 0 : i32
    return %arg0, %c0_i32, %c0_i32_0, %c0_i32_1 : i32, i32, i32, i32
  }
  func.func @transform_1(%arg0: i32) -> (i32, i32) {
    %c0_i32 = arith.constant 0 : i32
    %c0_i32_0 = arith.constant 0 : i32
    %c0_i32_1 = arith.constant 0 : i32
    return %c0_i32, %c0_i32_0 : i32, i32
  }
  func.func @transform_2(%arg0: i32) -> (i32, i32) {
    %c0_i32 = arith.constant 0 : i32
    %c0_i32_0 = arith.constant 0 : i32
    %c0_i32_1 = arith.constant 0 : i32
    return %c0_i32, %c0_i32_0 : i32, i32
  }
  func.func @transform_3(%arg0: i32) -> (i32, i32, i32) {
    %c0_i32 = arith.constant 0 : i32
    %c0_i32_0 = arith.constant 0 : i32
    %c0_i32_1 = arith.constant 0 : i32
    return %arg0, %c0_i32, %c0_i32_0 : i32, i32, i32
  }
}

</mosaic_0001>

<bundles_post_ra>
// kernel: tpu_custom_call.1
= control target key start
LH: loop header
LB: loop body
LE: loop exit
PB: predicated region body
PF: predicated region fallthrough
CT: control target
= control target key end

     0   :  { %8 = vsyncpa [#allocation4], 0  ;;  %s4037_s0 = inlined_call_operand.vmem [shape: f32[2,16,16,4], index: 0, kind: input, shape index: {}]   ;;  %s4038_s1 = inlined_call_operand.vmem [shape: f32[8,36], index: 1, kind: input, shape index: {}]   ;;  %s4039_s2 = inlined_call_operand.vmem [shape: f32[8,1], index: 2, kind: input, shape index: {}]   ;;  %s4040_s3 = inlined_call_operand.hbm [shape: f32[2,8,256], index: 3, kind: output, shape index: {}]  }
   0x1   :  { %10 = vsyncpa [#allocation4 + $0x1], 0  ;;  %s2289_s12 = smov 0   ;;  %s2291_s13 = smov 0  }
   0x2   :  { %s2293_s14 = smov 0   ;;  %s2295_s15 = smov 0  }
   0x3 LB: > { %s2310_s16 = sadd.s32 4294967295, %s2257_s15   ;;  %s2093_s17 = sadd.s32 4294967294, %s2257_s15   ;;  %s2257_s15 = sphi %s2295_s15, %s4335_s15   ;;  %s2253_s14 = sphi %s2293_s14, %s4334_s14   ;;  %s2249_s13 = sphi %s2291_s13, %s4333_s13   ;;  %s2245_s12 = sphi %s2289_s12, %s4332_s12  }
   0x4   : > { %s2314_s18 = sadd.s32 1, %s2257_s15   ;;  %s91_s19 = sadd.s32 1, %s2253_s14 }
   0x5   : > { %s88_s20 = ssub.s32 %s2257_s15, %s2314_s18  ;;  %p101_p0 = scmp.ne.s32.totalorder %s2253_s14, %s2249_s13 }
   0x6   : > { %p89_p1 = scmp.eq.s32.totalorder %s88_s20, 0  ;;  %p102_p2 = scmp.eq.s32.totalorder %s2310_s16, 1 }
   0x7   : > { %p107_p3 = scmp.ne.s32.totalorder %s2249_s13, %s2245_s12  ;;  %p108_p4 = scmp.eq.s32.totalorder %s2093_s17, 1 }
   0x8   : > { %s2325_s21 = scalar_select %p89_p1, %s2253_s14, %s91_s19  }
   0x9   : > { %p2327_p5 = por %p102_p2, %p101_p0  ;;  %p2331_p6 = por %p108_p4, %p107_p3 }
   0xa   : > { %p2096_p7 = scmp.ge.s32.totalorder %s2257_s15, 1  ;;  %p140_p8 = scmp.lt.s32.totalorder %s2257_s15, 3 }
   0xc   : > { %p141_p9 = pnand %p2096_p7, %p140_p8 }
   0xe   : > { %144 = sbr.rel (%p141_p9) target bundleno = 1002 (0x3ea), region = 32 }
  0x13   : > { %vm169_vm0 = vcmask 31744   ;;  %v2259_v0 = vmov 0.0   ;;  %s2260_s24 = smov 4   ;;  %p164_p10 = scmp.lt.s32.totalorder %s2310_s16, 1  ;;  %vm172_vm1 = vcmask 25600   ;;  %vm1635_vm2 = vcmask 64512  }
  0x14   : > { %170 = vst.msk [vmem:[#allocation2] sm:$0xff] %vm169_vm0, %v2259_v0  ;;  %s2261_s30 = smov 8   ;;  %s2262_s4 = smov 12   ;;  %vm1668_vm3 = vcmask 97280   ;;  %vm1701_vm4 = vcmask 130048   ;;  %vm1734_vm5 = vcmask 162816  }
  0x15   : > { %171 = vst.msk [vmem:[#allocation2 + $0x8] sm:$0xff] %vm169_vm0, %v2259_v0  ;;  %s165_s25 = scalar_select %p164_p10, %s2310_s16, 1  ;;  %vm1767_vm6 = vcmask 195584   ;;  %vm1833_vm7 = vcmask 261120   ;;  %vm1800_vm8 = vcmask 228352   ;;  %vm1873_vm9 = vcmask 293888  }
  0x16   : > { %174 = vst.msk [vmem:[#allocation2 + $0x18] sm:$0xff] %vm169_vm0, %v2259_v0  ;;  %s2263_s5 = smov 16   ;;  %s2264_s6 = smov 20  }
  0x17   : > { %175 = vst.msk [vmem:[#allocation2 + $0x20] sm:$0xff] %vm169_vm0, %v2259_v0  ;;  %s2139_s26 = sshll.u32 %s165_s25, 8  ;;  %s2265_s7 = smov 24  }
  0x18   : > { %177 = vst.msk [vmem:[#allocation2 + $0x30] sm:$0xff] %vm169_vm0, %v2259_v0  ;;  %s2405_s29 = scalar_lea.vmem %s4037_s0, %s2139_s26  ;;  %s2266_s8 = smov 28  }
  0x19   : > { %178 = vst.msk [vmem:[#allocation2 + $0x38] sm:$0xff] %vm169_vm0, %v2259_v0  ;;  %v227_v2 = vld [vmem:[%s2405_s29 + $0x10] sm:$0xff]  ;;  %v225_v3 = vld [vmem:[%s2405_s29] sm:$0xff]  ;;  %v228_v7 = vld [vmem:[%s2405_s29 + $0x18] sm:$0xff]  ;;  %s2267_s9 = smov 32   ;;  %s161_s20 = sand.u32 1, %s2249_s13  }
  0x1a   : > { %180 = vst.msk [vmem:[#allocation2 + $0x48] sm:$0xff] %vm169_vm0, %v2259_v0  ;;  %v226_v8 = vld [vmem:[%s2405_s29 + $0x8] sm:$0xff]  ;;  %v229_v9 = vld [vmem:[%s2405_s29 + $0x20] sm:$0xff]  ;;  %v231_v10 = vld [vmem:[%s2405_s29 + $0x30] sm:$0xff]  ;;  %s2140_s25 = sshll.u32 %s2310_s16, 4 }
  0x1b   : > { %181 = vst.msk [vmem:[#allocation2 + $0x50] sm:$0xff] %vm169_vm0, %v2259_v0  ;;  %v230_v11 = vld [vmem:[%s2405_s29 + $0x28] sm:$0xff]  ;;  %v232_v12 = vld [vmem:[%s2405_s29 + $0x38] sm:$0xff]  ;;  %v233_v14 = vld [vmem:[%s2405_s29 + $0x40] sm:$0xff]  ;;  %s2029_s28 = scalar_lea.hbm %s4040_s3, %s2140_s25 }
  0x1c   : > { %v322_v1 = vld [vmem:[#allocation2 + $0x1] sm:$0xff]  ;;  %183 = vst.msk [vmem:[#allocation2 + $0x60] sm:$0xff] %vm169_vm0, %v2259_v0  ;;  %v235_v15 = vld [vmem:[%s2405_s29 + $0x50] sm:$0xff]  ;;  %v236_v18 = vld [vmem:[%s2405_s29 + $0x58] sm:$0xff] }
  0x1d   : > { %611 = vrot.lane.b32.xlu0 %v322_v1, %s2260_s24  ;;  %184 = vst.msk [vmem:[#allocation2 + $0x68] sm:$0xff] %vm169_vm0, %v2259_v0  ;;  %v234_v13 = vld [vmem:[%s2405_s29 + $0x48] sm:$0xff]  ;;  %v237_v16 = vld [vmem:[%s2405_s29 + $0x60] sm:$0xff]  ;;  %v240_v22 = vld [vmem:[%s2405_s29 + $0x78] sm:$0xff] }
  0x1e   : > { %186 = vst.msk [vmem:[#allocation2 + $0x78] sm:$0xff] %vm169_vm0, %v2259_v0  ;;  %v238_v20 = vld [vmem:[%s2405_s29 + $0x68] sm:$0xff]  ;;  %v239_v23 = vld [vmem:[%s2405_s29 + $0x70] sm:$0xff]  ;;  %v241_v24 = vld [vmem:[%s2405_s29 + $0x80] sm:$0xff] }
  0x1f   : > { %187 = vst.msk [vmem:[#allocation2 + $0x80] sm:$0xff] %vm169_vm0, %v2259_v0  ;;  %v243_v25 = vld [vmem:[%s2405_s29 + $0x90] sm:$0xff]  ;;  %v242_v27 = vld [vmem:[%s2405_s29 + $0x88] sm:$0xff]  ;;  %v244_v29 = vld [vmem:[%s2405_s29 + $0x98] sm:$0xff] }
  0x20   : > { %189 = vst.msk [vmem:[#allocation2 + $0x90] sm:$0xff] %vm169_vm0, %v2259_v0  ;;  %v246_v31 = vld [vmem:[%s2405_s29 + $0xa8] sm:$0xff]  ;;  %v245_v32 = vld [vmem:[%s2405_s29 + $0xa0] sm:$0xff]  ;;  %v247_v33 = vld [vmem:[%s2405_s29 + $0xb0] sm:$0xff] }
  0x21   : > { %190 = vst.msk [vmem:[#allocation2 + $0x98] sm:$0xff] %vm169_vm0, %v2259_v0  ;;  %v249_v37 = vld [vmem:[%s2405_s29 + $0xc0] sm:$0xff]  ;;  %v248_v38 = vld [vmem:[%s2405_s29 + $0xb8] sm:$0xff]  ;;  %v250_v39 = vld [vmem:[%s2405_s29 + $0xc8] sm:$0xff] }
  0x22   : > { %192 = vst.msk [vmem:[#allocation2 + $0xa8] sm:$0xff] %vm169_vm0, %v2259_v0  ;;  %v252_v43 = vld [vmem:[%s2405_s29 + $0xd8] sm:$0xff]  ;;  %v251_v44 = vld [vmem:[%s2405_s29 + $0xd0] sm:$0xff]  ;;  %v253_v45 = vld [vmem:[%s2405_s29 + $0xe0] sm:$0xff] }
  0x23   : > { %193 = vst.msk [vmem:[#allocation2 + $0xb0] sm:$0xff] %vm169_vm0, %v2259_v0  ;;  %v254_v49 = vld [vmem:[%s2405_s29 + $0xe8] sm:$0xff] }
  0x24   : > { %195 = vst.msk [vmem:[#allocation2 + $0xc0] sm:$0xff] %vm169_vm0, %v2259_v0  ;;  %v354_v62 = vld [vmem:[#allocation2 + $0x2] sm:$0xff] }
  0x25   : > { %196 = vst.msk [vmem:[#allocation2 + $0xc8] sm:$0xff] %vm169_vm0, %v2259_v0 }
  0x26   : > { %198 = vst.msk [vmem:[#allocation2 + $0xd8] sm:$0xff] %vm169_vm0, %v2259_v0 }
  0x27   : > { %199 = vst.msk [vmem:[#allocation2 + $0xe0] sm:$0xff] %vm169_vm0, %v2259_v0 }
  0x28   : > { %201 = vst.msk [vmem:[#allocation2 + $0xf0] sm:$0xff] %vm169_vm0, %v2259_v0 }
  0x29   : > { %202 = vst.msk [vmem:[#allocation2 + $0xf8] sm:$0xff] %vm169_vm0, %v2259_v0 }
  0x2a   : > { %204 = vst.msk [vmem:[#allocation2 + $0x108] sm:$0xff] %vm169_vm0, %v2259_v0 }
  0x2b   : > { %205 = vst.msk [vmem:[#allocation2 + $0x110] sm:$0xff] %vm169_vm0, %v2259_v0 }
  0x2c   : > { %207 = vst.msk [vmem:[#allocation2 + $0x120] sm:$0xff] %vm169_vm0, %v2259_v0 }
  0x2d   : > { %208 = vst.msk [vmem:[#allocation2 + $0x128] sm:$0xff] %vm169_vm0, %v2259_v0 }
  0x2e   : > { %210 = vst.msk [vmem:[#allocation2 + $0x138] sm:$0xff] %vm169_vm0, %v2259_v0 }
  0x2f   : > { %211 = vst.msk [vmem:[#allocation2 + $0x140] sm:$0xff] %vm169_vm0, %v2259_v0 }
  0x30   : > { %213 = vst.msk [vmem:[#allocation2 + $0x150] sm:$0xff] %vm169_vm0, %v2259_v0 }
  0x31   : > { %214 = vst.msk [vmem:[#allocation2 + $0x158] sm:$0xff] %vm169_vm0, %v2259_v0 }
  0x32   : > { %216 = vst.msk [vmem:[#allocation2 + $0x168] sm:$0xff] %vm169_vm0, %v2259_v0 }
  0x33   : > { %217 = vst.msk [vmem:[#allocation2 + $0x170] sm:$0xff] %vm169_vm0, %v2259_v0 }
  0x34   : > { %219 = vst.msk [vmem:[#allocation2 + $0x180] sm:$0xff] %vm169_vm0, %v2259_v0 }
  0x35   : > { %220 = vst.msk [vmem:[#allocation2 + $0x188] sm:$0xff] %vm169_vm0, %v2259_v0 }
  0x36   : > { %222 = vst.msk [vmem:[#allocation2 + $0x198] sm:$0xff] %vm169_vm0, %v2259_v0 }
  0x37   : > { %223 = vst.msk [vmem:[#allocation2 + $0x1a0] sm:$0xff] %vm169_vm0, %v2259_v0 }
  0x38   : > { %260 = vst.msk [vmem:[#allocation2 + $0x31] sm:$0xff] %vm169_vm0, %v227_v2 }
  0x39   : > { %258 = vst.msk [vmem:[#allocation2 + $0x19] sm:$0xff] %vm169_vm0, %v225_v3 }
  0x3a   : > { %173 = vst.msk [vmem:[#allocation2 + $0x10] sm:$0x3] %vm172_vm1, %v2259_v0 }
  0x3b   : > { %176 = vst.msk [vmem:[#allocation2 + $0x28] sm:$0x3] %vm172_vm1, %v2259_v0 }
  0x3c   : > { %179 = vst.msk [vmem:[#allocation2 + $0x40] sm:$0x3] %vm172_vm1, %v2259_v0 }
  0x3d   : > { %182 = vst.msk [vmem:[#allocation2 + $0x58] sm:$0x3] %vm172_vm1, %v2259_v0 }
  0x3e   : > { %185 = vst.msk [vmem:[#allocation2 + $0x70] sm:$0x3] %vm172_vm1, %v2259_v0 }
  0x3f   : > { %v2431_v4 = vld [vmem:[#allocation2 + $0x31] sm:$0xff]  ;;  %188 = vst.msk [vmem:[#allocation2 + $0x88] sm:$0x3] %vm172_vm1, %v2259_v0 }
  0x40   : > { %619 = vrot.lane.b32.xlu2 %v2431_v4, %s2260_s24  ;;  %v2437_v5 = vld [vmem:[#allocation2 + $0x19] sm:$0xff]  ;;  %191 = vst.msk [vmem:[#allocation2 + $0xa0] sm:$0x3] %vm172_vm1, %v2259_v0 }
  0x41   : > { %615 = vrot.lane.b32.xlu1 %v2437_v5, %s2260_s24  ;;  %v323_v6 = vld [vmem:[#allocation2 + $0x9] sm:$0xff]  ;;  %194 = vst.msk [vmem:[#allocation2 + $0xb8] sm:$0x3] %vm172_vm1, %v2259_v0 }
  0x42   : > { %613 = vrot.lane.b32.xlu0 %v323_v6, %s2260_s24  ;;  %197 = vst.msk [vmem:[#allocation2 + $0xd0] sm:$0x3] %vm172_vm1, %v2259_v0 }
  0x43   : > { %200 = vst.msk [vmem:[#allocation2 + $0xe8] sm:$0x3] %vm172_vm1, %v2259_v0 }
  0x44   : > { %203 = vst.msk [vmem:[#allocation2 + $0x100] sm:$0x3] %vm172_vm1, %v2259_v0 }
  0x45   : > { %206 = vst.msk [vmem:[#allocation2 + $0x118] sm:$0x3] %vm172_vm1, %v2259_v0 }
  0x46   : > { %209 = vst.msk [vmem:[#allocation2 + $0x130] sm:$0x3] %vm172_vm1, %v2259_v0 }
  0x47   : > { %212 = vst.msk [vmem:[#allocation2 + $0x148] sm:$0x3] %vm172_vm1, %v2259_v0 }
  0x48   : > { %215 = vst.msk [vmem:[#allocation2 + $0x160] sm:$0x3] %vm172_vm1, %v2259_v0 }
  0x49   : > { %218 = vst.msk [vmem:[#allocation2 + $0x178] sm:$0x3] %vm172_vm1, %v2259_v0 }
  0x4a   : > { %221 = vst.msk [vmem:[#allocation2 + $0x190] sm:$0x3] %vm172_vm1, %v2259_v0 }
  0x4b   : > { %224 = vst.msk [vmem:[#allocation2 + $0x1a8] sm:$0x3] %vm172_vm1, %v2259_v0  ;;  %v355_v0 = vld [vmem:[#allocation2 + $0xa] sm:$0xff] }
  0x4c   : > { %261 = vst.msk [vmem:[#allocation2 + $0x39] sm:$0xff] %vm169_vm0, %v228_v7 }
  0x4d   : > { %259 = vst.msk [vmem:[#allocation2 + $0x21] sm:$0xff] %vm169_vm0, %v226_v8 }
  0x4e   : > { %262 = vst.msk [vmem:[#allocation2 + $0x49] sm:$0xff] %vm169_vm0, %v229_v9 }
  0x4f   : > { %264 = vst.msk [vmem:[#allocation2 + $0x61] sm:$0xff] %vm169_vm0, %v231_v10 }
  0x50   : > { %263 = vst.msk [vmem:[#allocation2 + $0x51] sm:$0xff] %vm169_vm0, %v230_v11 }
  0x51   : > { %265 = vst.msk [vmem:[#allocation2 + $0x69] sm:$0xff] %vm169_vm0, %v232_v12 }
  0x52   : > { %267 = vst.msk [vmem:[#allocation2 + $0x81] sm:$0xff] %vm169_vm0, %v234_v13 }
  0x53   : > { %v2483_v17 = vld [vmem:[#allocation2 + $0x39] sm:$0xff]  ;;  %266 = vst.msk [vmem:[#allocation2 + $0x79] sm:$0xff] %vm169_vm0, %v233_v14 }
  0x54   : > { %621 = vrot.lane.b32.xlu2 %v2483_v17, %s2260_s24  ;;  %v2489_v19 = vld [vmem:[#allocation2 + $0x21] sm:$0xff]  ;;  %268 = vst.msk [vmem:[#allocation2 + $0x91] sm:$0xff] %vm169_vm0, %v235_v15  ;;  %v2640_v3 = vld [vmem:[#allocation2 + $0x32] sm:$0xff] }
  0x55   : > { %617 = vrot.lane.b32.xlu1 %v2489_v19, %s2260_s24  ;;  %v2495_v21 = vld [vmem:[#allocation2 + $0x49] sm:$0xff]  ;;  %270 = vst.msk [vmem:[#allocation2 + $0xa9] sm:$0xff] %vm169_vm0, %v237_v16  ;;  %v2638_v2 = vld [vmem:[#allocation2 + $0x1a] sm:$0xff] }
  0x56   : > { %623 = vrot.lane.b32.xlu0 %v2495_v21, %s2260_s24  ;;  %269 = vst.msk [vmem:[#allocation2 + $0x99] sm:$0xff] %vm169_vm0, %v236_v18  ;;  %v2507_v26 = vld [vmem:[#allocation2 + $0x61] sm:$0xff] }
  0x57   : > { %271 = vst.msk [vmem:[#allocation2 + $0xb1] sm:$0xff] %vm169_vm0, %v238_v20  ;;  %v2511_v28 = vld [vmem:[#allocation2 + $0x51] sm:$0xff]  ;;  %v2636_v1 = vld [vmem:[#allocation2 + $0x22] sm:$0xff]  ;;  %v2652_v8 = vld [vmem:[#allocation2 + $0x3a] sm:$0xff] }
  0x58   : > { %273 = vst.msk [vmem:[#allocation2 + $0xc9] sm:$0xff] %vm169_vm0, %v240_v22  ;;  %v2515_v30 = vld [vmem:[#allocation2 + $0x69] sm:$0xff]  ;;  %v2654_v9 = vld [vmem:[#allocation2 + $0x52] sm:$0xff] }
  0x59   : > { %272 = vst.msk [vmem:[#allocation2 + $0xc1] sm:$0xff] %vm169_vm0, %v239_v23  ;;  %v2532_v34 = vld [vmem:[#allocation2 + $0x81] sm:$0xff]  ;;  %v2650_v7 = vld [vmem:[#allocation2 + $0x4a] sm:$0xff] }
  0x5a   : > { %274 = vst.msk [vmem:[#allocation2 + $0xd9] sm:$0xff] %vm169_vm0, %v241_v24  ;;  %v2534_v35 = vld [vmem:[#allocation2 + $0x79] sm:$0xff]  ;;  %v2664_v11 = vld [vmem:[#allocation2 + $0x6a] sm:$0xff]  ;;  %v2666_v12 = vld [vmem:[#allocation2 + $0x62] sm:$0xff] }
  0x5b   : > { %276 = vst.msk [vmem:[#allocation2 + $0xf1] sm:$0xff] %vm169_vm0, %v243_v25  ;;  %v2536_v36 = vld [vmem:[#allocation2 + $0x91] sm:$0xff]  ;;  %v2668_v13 = vld [vmem:[#allocation2 + $0x7a] sm:$0xff]  ;;  %v2682_v18 = vld [vmem:[#allocation2 + $0x82] sm:$0xff] }
  0x5c   : > { %627 = vrot.lane.b32.xlu2 %v2507_v26, %s2260_s24  ;;  %275 = vst.msk [vmem:[#allocation2 + $0xe1] sm:$0xff] %vm169_vm0, %v242_v27  ;;  %v2550_v40 = vld [vmem:[#allocation2 + $0xa9] sm:$0xff] }
  0x5d   : > { %625 = vrot.lane.b32.xlu1 %v2511_v28, %s2260_s24  ;;  %277 = vst.msk [vmem:[#allocation2 + $0xf9] sm:$0xff] %vm169_vm0, %v244_v29  ;;  %v2552_v41 = vld [vmem:[#allocation2 + $0x99] sm:$0xff] }
  0x5e   : > { %629 = vrot.lane.b32.xlu0 %v2515_v30, %s2260_s24  ;;  %279 = vst.msk [vmem:[#allocation2 + $0x111] sm:$0xff] %vm169_vm0, %v246_v31  ;;  %v2554_v42 = vld [vmem:[#allocation2 + $0xb1] sm:$0xff]  ;;  %v2684_v20 = vld [vmem:[#allocation2 + $0x9a] sm:$0xff] }
  0x5f   : > { %278 = vst.msk [vmem:[#allocation2 + $0x109] sm:$0xff] %vm169_vm0, %v245_v32  ;;  %v2568_v46 = vld [vmem:[#allocation2 + $0xc9] sm:$0xff]  ;;  %v2680_v16 = vld [vmem:[#allocation2 + $0x92] sm:$0xff] }
  0x60   : > { %280 = vst.msk [vmem:[#allocation2 + $0x121] sm:$0xff] %vm169_vm0, %v247_v33  ;;  %v2570_v47 = vld [vmem:[#allocation2 + $0xc1] sm:$0xff]  ;;  %v2698_v25 = vld [vmem:[#allocation2 + $0xb2] sm:$0xff]  ;;  %v2700_v27 = vld [vmem:[#allocation2 + $0xaa] sm:$0xff] }
  0x61   : > { %282 = vst.msk [vmem:[#allocation2 + $0x139] sm:$0xff] %vm169_vm0, %v249_v37  ;;  %v2572_v48 = vld [vmem:[#allocation2 + $0xd9] sm:$0xff]  ;;  %v2702_v29 = vld [vmem:[#allocation2 + $0xc2] sm:$0xff] }
  0x62   : > { %281 = vst.msk [vmem:[#allocation2 + $0x129] sm:$0xff] %vm169_vm0, %v248_v38  ;;  %v2582_v50 = vld [vmem:[#allocation2 + $0xf1] sm:$0xff] }
  0x63   : > { %283 = vst.msk [vmem:[#allocation2 + $0x141] sm:$0xff] %vm169_vm0, %v250_v39  ;;  %v2584_v51 = vld [vmem:[#allocation2 + $0xe1] sm:$0xff]  ;;  %v2718_v38 = vld [vmem:[#allocation2 + $0xca] sm:$0xff] }
  0x64   : > { %633 = vrot.lane.b32.xlu2 %v2532_v34, %s2260_s24  ;;  %285 = vst.msk [vmem:[#allocation2 + $0x159] sm:$0xff] %vm169_vm0, %v252_v43  ;;  %v2586_v52 = vld [vmem:[#allocation2 + $0xf9] sm:$0xff]  ;;  %v2720_v39 = vld [vmem:[#allocation2 + $0xe2] sm:$0xff] }
  0x65   : > { %631 = vrot.lane.b32.xlu1 %v2534_v35, %s2260_s24  ;;  %284 = vst.msk [vmem:[#allocation2 + $0x151] sm:$0xff] %vm169_vm0, %v251_v44  ;;  %v2594_v53 = vld [vmem:[#allocation2 + $0x111] sm:$0xff]  ;;  %v2716_v37 = vld [vmem:[#allocation2 + $0xda] sm:$0xff] }
  0x66   : > { %635 = vrot.lane.b32.xlu0 %v2536_v36, %s2260_s24  ;;  %286 = vst.msk [vmem:[#allocation2 + $0x169] sm:$0xff] %vm169_vm0, %v253_v45  ;;  %v2596_v54 = vld [vmem:[#allocation2 + $0x109] sm:$0xff] }
  0x67   : > { %287 = vst.msk [vmem:[#allocation2 + $0x171] sm:$0xff] %vm169_vm0, %v254_v49  ;;  %v2598_v55 = vld [vmem:[#allocation2 + $0x121] sm:$0xff] }
  0x68   : > { %v2606_v56 = vld [vmem:[#allocation2 + $0x139] sm:$0xff] }
  0x69   : > { %v2608_v57 = vld [vmem:[#allocation2 + $0x129] sm:$0xff]  ;;  %v2734_v49 = vld [vmem:[#allocation2 + $0xfa] sm:$0xff] }
  0x6a   : > { %v2610_v58 = vld [vmem:[#allocation2 + $0x141] sm:$0xff] }
  0x6b   : > { %v2618_v59 = vld [vmem:[#allocation2 + $0x159] sm:$0xff] }
  0x6c   : > { %639 = vrot.lane.b32.xlu2 %v2550_v40, %s2260_s24  ;;  %v2620_v60 = vld [vmem:[#allocation2 + $0x151] sm:$0xff] }
  0x6d   : > { %637 = vrot.lane.b32.xlu1 %v2552_v41, %s2260_s24  ;;  %v2622_v61 = vld [vmem:[#allocation2 + $0x169] sm:$0xff] }
  0x6e   : > { %641 = vrot.lane.b32.xlu0 %v2554_v42, %s2260_s24  ;;  %v2630_v63 = vld [vmem:[#allocation2 + $0x171] sm:$0xff] }
  0x74   : > { %645 = vrot.lane.b32.xlu2 %v2568_v46, %s2260_s24 }
  0x75   : > { %643 = vrot.lane.b32.xlu1 %v2570_v47, %s2260_s24 }
  0x76   : > { %647 = vrot.lane.b32.xlu0 %v2572_v48, %s2260_s24 }
  0x7c   : > { %651 = vrot.lane.b32.xlu2 %v2582_v50, %s2260_s24 }
  0x7d   : > { %649 = vrot.lane.b32.xlu1 %v2584_v51, %s2260_s24 }
  0x7e   : > { %653 = vrot.lane.b32.xlu0 %v2586_v52, %s2260_s24 }
  0x84   : > { %657 = vrot.lane.b32.xlu2 %v2594_v53, %s2260_s24 }
  0x85   : > { %655 = vrot.lane.b32.xlu1 %v2596_v54, %s2260_s24 }
  0x86   : > { %659 = vrot.lane.b32.xlu0 %v2598_v55, %s2260_s24 }
  0x8c   : > { %663 = vrot.lane.b32.xlu2 %v2606_v56, %s2260_s24 }
  0x8d   : > { %661 = vrot.lane.b32.xlu1 %v2608_v57, %s2260_s24 }
  0x8e   : > { %665 = vrot.lane.b32.xlu0 %v2610_v58, %s2260_s24 }
  0x8f   : > { %v2672_v14 = vpop.permute.xlu0 %611 }
  0x90   : > { %4091 = vst [vmem:[#allocation8_spill] sm:$0xff] %v2672_v14 }
  0x94   : > { %669 = vrot.lane.b32.xlu2 %v2618_v59, %s2260_s24 }
  0x95   : > { %667 = vrot.lane.b32.xlu1 %v2620_v60, %s2260_s24 }
  0x96   : > { %671 = vrot.lane.b32.xlu0 %v2622_v61, %s2260_s24 }
  0x9a   : > { %v2644_v6 = vpop.permute.xlu2 %619 }
  0x9b   : > { %4089 = vst [vmem:[#allocation6_spill] sm:$0xff] %v2644_v6  ;;  %v2772_v6 = vld [vmem:[#allocation2 + $0x13a] sm:$0xff] }
  0x9c   : > { %739 = vrot.lane.b32.xlu2 %v354_v62, %s2261_s30  ;;  %v2736_v62 = vld [vmem:[#allocation2 + $0xf2] sm:$0xff] }
  0x9d   : > { %673 = vrot.lane.b32.xlu1 %v2630_v63, %s2260_s24  ;;  %s2097_s24 = sshll.u32 %s161_s20, 4 }
  0x9e   : > { %741 = vrot.lane.b32.xlu0 %v355_v0, %s2261_s30  ;;  %v2738_v0 = vld [vmem:[#allocation2 + $0x10a] sm:$0xff] }
  0xa4   : > { %745 = vrot.lane.b32.xlu2 %v2636_v1, %s2261_s30 }
  0xa5   : > { %743 = vrot.lane.b32.xlu1 %v2638_v2, %s2261_s30 }
  0xa6   : > { %747 = vrot.lane.b32.xlu0 %v2640_v3, %s2261_s30 }
  0xac   : > { %751 = vrot.lane.b32.xlu2 %v2650_v7, %s2261_s30 }
  0xad   : > { %749 = vrot.lane.b32.xlu1 %v2652_v8, %s2261_s30 }
  0xae   : > { %753 = vrot.lane.b32.xlu0 %v2654_v9, %s2261_s30  ;;  %v2662_v10 = vpop.permute.xlu2 %621 }
  0xaf   : > { %4090 = vst [vmem:[#allocation7_spill] sm:$0xff] %v2662_v10  ;;  %v2754_v10 = vld [vmem:[#allocation2 + $0x112] sm:$0xff] }
  0xb3   : > { %v2690_v22 = vpop.permute.xlu1 %615 }
  0xb4   : > { %757 = vrot.lane.b32.xlu2 %v2664_v11, %s2261_s30  ;;  %4093 = vst [vmem:[#allocation10_spill] sm:$0xff] %v2690_v22  ;;  %v2696_v24 = vpop.permute.xlu0 %613  ;;  %v2756_v22 = vld [vmem:[#allocation2 + $0x12a] sm:$0xff] }
  0xb5   : > { %755 = vrot.lane.b32.xlu1 %v2666_v12, %s2261_s30  ;;  %4095 = vst [vmem:[#allocation12_spill] sm:$0xff] %v2696_v24  ;;  %v2774_v24 = vld [vmem:[#allocation2 + $0x152] sm:$0xff] }
  0xb6   : > { %759 = vrot.lane.b32.xlu0 %v2668_v13, %s2261_s30  ;;  %v2678_v15 = vpop.permute.xlu2 %627  ;;  %4105 = vst [vmem:[#allocation22_spill] sm:$0xff] %v2756_v22 }
  0xb7   : > { %4092 = vst [vmem:[#allocation9_spill] sm:$0xff] %v2678_v15 }
  0xb8   : > { %4110 = vst [vmem:[#allocation27_spill] sm:$0xff] %v2774_v24 }
  0xbc   : > { %763 = vrot.lane.b32.xlu2 %v2680_v16, %s2261_s30 }
  0xbd   : > { %761 = vrot.lane.b32.xlu1 %v2682_v18, %s2261_s30 }
  0xbe   : > { %765 = vrot.lane.b32.xlu0 %v2684_v20, %s2261_s30  ;;  %v2694_v23 = vpop.permute.xlu2 %633 }
  0xbf   : > { %4094 = vst [vmem:[#allocation11_spill] sm:$0xff] %v2694_v23 }
  0xc4   : > { %769 = vrot.lane.b32.xlu2 %v2698_v25, %s2261_s30 }
  0xc5   : > { %767 = vrot.lane.b32.xlu1 %v2700_v27, %s2261_s30 }
  0xc6   : > { %771 = vrot.lane.b32.xlu0 %v2702_v29, %s2261_s30  ;;  %v2710_v31 = vpop.permute.xlu2 %639 }
  0xc7   : > { %4096 = vst [vmem:[#allocation13_spill] sm:$0xff] %v2710_v31  ;;  %v2712_v32 = vpop.permute.xlu1 %617  ;;  %v2790_v31 = vld [vmem:[#allocation2 + $0x15a] sm:$0xff] }
  0xc8   : > { %4097 = vst [vmem:[#allocation14_spill] sm:$0xff] %v2712_v32  ;;  %v2714_v33 = vpop.permute.xlu0 %623  ;;  %v2806_v32 = vld [vmem:[#allocation2 + $0x20] sm:$0xff] }
  0xc9   : > { %4098 = vst [vmem:[#allocation15_spill] sm:$0xff] %v2714_v33  ;;  %v2752_v33 = vld [vmem:[#allocation2 + $0x122] sm:$0xff] }
  0xca   : > { %4115 = vst [vmem:[#allocation32_spill] sm:$0xff] %v2790_v31 }
  0xcb   : > { %4120 = vst [vmem:[#allocation37_spill] sm:$0xff] %v2806_v32 }
  0xcc   : > { %775 = vrot.lane.b32.xlu2 %v2716_v37, %s2261_s30 }
  0xcd   : > { %773 = vrot.lane.b32.xlu1 %v2718_v38, %s2261_s30 }
  0xce   : > { %777 = vrot.lane.b32.xlu0 %v2720_v39, %s2261_s30  ;;  %v2728_v43 = vpop.permute.xlu2 %645 }
  0xcf   : > { %4099 = vst [vmem:[#allocation16_spill] sm:$0xff] %v2728_v43  ;;  %v2730_v44 = vpop.permute.xlu1 %625  ;;  %v2788_v43 = vld [vmem:[#allocation2 + $0x16a] sm:$0xff] }
  0xd0   : > { %4100 = vst [vmem:[#allocation17_spill] sm:$0xff] %v2730_v44  ;;  %v2732_v45 = vpop.permute.xlu0 %629  ;;  %v2770_v44 = vld [vmem:[#allocation2 + $0x142] sm:$0xff] }
  0xd1   : > { %4101 = vst [vmem:[#allocation18_spill] sm:$0xff] %v2732_v45 }
  0xd2   : > { %4109 = vst [vmem:[#allocation26_spill] sm:$0xff] %v2770_v44 }
  0xd3   : > { %4114 = vst [vmem:[#allocation31_spill] sm:$0xff] %v2788_v43 }
  0xd4   : > { %781 = vrot.lane.b32.xlu2 %v2734_v49, %s2261_s30 }
  0xd5   : > { %779 = vrot.lane.b32.xlu1 %v2736_v62, %s2261_s30 }
  0xd6   : > { %783 = vrot.lane.b32.xlu0 %v2738_v0, %s2261_s30  ;;  %v2746_v23 = vpop.permute.xlu2 %651 }
  0xd7   : > { %4102 = vst [vmem:[#allocation19_spill] sm:$0xff] %v2746_v23  ;;  %v2748_v15 = vpop.permute.xlu1 %631 }
  0xd8   : > { %4103 = vst [vmem:[#allocation20_spill] sm:$0xff] %v2748_v15  ;;  %v2750_v45 = vpop.permute.xlu0 %635 }
  0xd9   : > { %4104 = vst [vmem:[#allocation21_spill] sm:$0xff] %v2750_v45 }
  0xdc   : > { %787 = vrot.lane.b32.xlu2 %v2752_v33, %s2261_s30 }
  0xdd   : > { %785 = vrot.lane.b32.xlu1 %v2754_v10, %s2261_s30 }
  0xde   : > { %789 = vrot.lane.b32.xlu0 %v2756_v22, %s2261_s30  ;;  %v2764_v14 = vpop.permute.xlu2 %657  ;;  %v2904_v22 = vld [vmem:[#allocation2 + $0xe0] sm:$0xff] }
  0xdf   : > { %4106 = vst [vmem:[#allocation23_spill] sm:$0xff] %v2764_v14  ;;  %v2766_v15 = vpop.permute.xlu1 %637 }
  0xe0   : > { %4107 = vst [vmem:[#allocation24_spill] sm:$0xff] %v2766_v15  ;;  %v2768_v45 = vpop.permute.xlu0 %641 }
  0xe1   : > { %4108 = vst [vmem:[#allocation25_spill] sm:$0xff] %v2768_v45  ;;  %v2792_v45 = vld [vmem:[#allocation2 + $0x172] sm:$0xff] }
  0xe2   : > { %4116 = vst [vmem:[#allocation33_spill] sm:$0xff] %v2792_v45 }
  0xe3   : > { %4152 = vst [vmem:[#allocation69_spill] sm:$0xff] %v2904_v22 }
  0xe4   : > { %793 = vrot.lane.b32.xlu2 %v2770_v44, %s2261_s30  ;;  %v256_v44 = vld [vmem:[%s2405_s29 + $0xf8] sm:$0xff] }
  0xe5   : > { %791 = vrot.lane.b32.xlu1 %v2772_v6, %s2261_s30  ;;  %289 = vst.msk [vmem:[#allocation2 + $0x189] sm:$0xff] %vm169_vm0, %v256_v44 }
  0xe6   : > { %795 = vrot.lane.b32.xlu0 %v2774_v24, %s2261_s30  ;;  %v2782_v14 = vpop.permute.xlu2 %663  ;;  %v2808_v24 = vld [vmem:[#allocation2 + $0x18] sm:$0xff] }
  0xe7   : > { %4111 = vst [vmem:[#allocation28_spill] sm:$0xff] %v2782_v14  ;;  %v2784_v15 = vpop.permute.xlu1 %643 }
  0xe8   : > { %4112 = vst [vmem:[#allocation29_spill] sm:$0xff] %v2784_v15  ;;  %v2786_v23 = vpop.permute.xlu0 %647 }
  0xe9   : > { %4113 = vst [vmem:[#allocation30_spill] sm:$0xff] %v2786_v23 }
  0xea   : > { %4121 = vst [vmem:[#allocation38_spill] sm:$0xff] %v2808_v24 }
  0xec   : > { %799 = vrot.lane.b32.xlu2 %v2788_v43, %s2261_s30  ;;  %v2812_v43 = vld [vmem:[#allocation2 + $0x30] sm:$0xff] }
  0xed   : > { %797 = vrot.lane.b32.xlu1 %v2790_v31, %s2261_s30  ;;  %4122 = vst [vmem:[#allocation39_spill] sm:$0xff] %v2812_v43  ;;  %v2826_v31 = vld [vmem:[#allocation2 + $0x38] sm:$0xff] }
  0xee   : > { %801 = vrot.lane.b32.xlu0 %v2792_v45, %s2261_s30  ;;  %v2800_v14 = vpop.permute.xlu2 %669  ;;  %v2824_v45 = vld [vmem:[#allocation2 + $0x48] sm:$0xff]  ;;  %4127 = vst [vmem:[#allocation44_spill] sm:$0xff] %v2826_v31 }
  0xef   : > { %4117 = vst [vmem:[#allocation34_spill] sm:$0xff] %v2800_v14  ;;  %v2802_v15 = vpop.permute.xlu1 %649 }
  0xf0   : > { %4118 = vst [vmem:[#allocation35_spill] sm:$0xff] %v2802_v15  ;;  %v2804_v23 = vpop.permute.xlu0 %653 }
  0xf1   : > { %4119 = vst [vmem:[#allocation36_spill] sm:$0xff] %v2804_v23 }
  0xf2   : > { %4126 = vst [vmem:[#allocation43_spill] sm:$0xff] %v2824_v45 }
  0xf4   : > { %869 = vrot.lane.b32.xlu2 %v2806_v32, %s2262_s4  ;;  %v2830_v32 = vld [vmem:[#allocation2 + $0x50] sm:$0xff] }
  0xf5   : > { %867 = vrot.lane.b32.xlu1 %v2808_v24, %s2262_s4  ;;  %4128 = vst [vmem:[#allocation45_spill] sm:$0xff] %v2830_v32 }
  0xf6   : > { %871 = vrot.lane.b32.xlu0 %v2812_v43, %s2262_s4  ;;  %v2818_v14 = vpop.permute.xlu2 %739 }
  0xf7   : > { %4123 = vst [vmem:[#allocation40_spill] sm:$0xff] %v2818_v14  ;;  %v2820_v15 = vpop.permute.xlu1 %655 }
  0xf8   : > { %4124 = vst [vmem:[#allocation41_spill] sm:$0xff] %v2820_v15  ;;  %v2822_v23 = vpop.permute.xlu0 %659  ;;  %v2842_v15 = vld [vmem:[#allocation2 + $0x68] sm:$0xff] }
  0xf9   : > { %4125 = vst [vmem:[#allocation42_spill] sm:$0xff] %v2822_v23  ;;  %v2844_v23 = vld [vmem:[#allocation2 + $0x60] sm:$0xff] }
  0xfa   : > { %4132 = vst [vmem:[#allocation49_spill] sm:$0xff] %v2842_v15 }
  0xfb   : > { %4133 = vst [vmem:[#allocation50_spill] sm:$0xff] %v2844_v23 }
  0xfc   : > { %875 = vrot.lane.b32.xlu2 %v2824_v45, %s2262_s4  ;;  %v2848_v45 = vld [vmem:[#allocation2 + $0x78] sm:$0xff] }
  0xfd   : > { %873 = vrot.lane.b32.xlu1 %v2826_v31, %s2262_s4  ;;  %4134 = vst [vmem:[#allocation51_spill] sm:$0xff] %v2848_v45 }
  0xfe   : > { %877 = vrot.lane.b32.xlu0 %v2830_v32, %s2262_s4  ;;  %v2836_v14 = vpop.permute.xlu2 %745 }
  0xff   : > { %4129 = vst [vmem:[#allocation46_spill] sm:$0xff] %v2836_v14  ;;  %v2838_v24 = vpop.permute.xlu1 %661  ;;  %v2862_v14 = vld [vmem:[#allocation2 + $0x80] sm:$0xff] }
 0x100   : > { %4130 = vst [vmem:[#allocation47_spill] sm:$0xff] %v2838_v24  ;;  %v2840_v43 = vpop.permute.xlu0 %665  ;;  %v2860_v24 = vld [vmem:[#allocation2 + $0x90] sm:$0xff] }
 0x101   : > { %4131 = vst [vmem:[#allocation48_spill] sm:$0xff] %v2840_v43 }
 0x102   : > { %4138 = vst [vmem:[#allocation55_spill] sm:$0xff] %v2860_v24 }
 0x103   : > { %4139 = vst [vmem:[#allocation56_spill] sm:$0xff] %v2862_v14 }
 0x104   : > { %881 = vrot.lane.b32.xlu2 %v2842_v15, %s2262_s4  ;;  %v2866_v15 = vld [vmem:[#allocation2 + $0x98] sm:$0xff] }
 0x105   : > { %879 = vrot.lane.b32.xlu1 %v2844_v23, %s2262_s4  ;;  %4140 = vst [vmem:[#allocation57_spill] sm:$0xff] %v2866_v15 }
 0x106   : > { %883 = vrot.lane.b32.xlu0 %v2848_v45, %s2262_s4  ;;  %v2854_v31 = vpop.permute.xlu2 %751  ;;  %v2878_v45 = vld [vmem:[#allocation2 + $0xb0] sm:$0xff] }
 0x107   : > { %4135 = vst [vmem:[#allocation52_spill] sm:$0xff] %v2854_v31  ;;  %v2856_v32 = vpop.permute.xlu1 %667 }
 0x108   : > { %4136 = vst [vmem:[#allocation53_spill] sm:$0xff] %v2856_v32  ;;  %v2858_v43 = vpop.permute.xlu0 %671  ;;  %v2880_v32 = vld [vmem:[#allocation2 + $0xa8] sm:$0xff] }
 0x109   : > { %4137 = vst [vmem:[#allocation54_spill] sm:$0xff] %v2858_v43 }
 0x10a   : > { %4144 = vst [vmem:[#allocation61_spill] sm:$0xff] %v2878_v45 }
 0x10b   : > { %4145 = vst [vmem:[#allocation62_spill] sm:$0xff] %v2880_v32 }
 0x10c   : > { %887 = vrot.lane.b32.xlu2 %v2860_v24, %s2262_s4  ;;  %v2884_v24 = vld [vmem:[#allocation2 + $0xc0] sm:$0xff] }
 0x10d   : > { %885 = vrot.lane.b32.xlu1 %v2862_v14, %s2262_s4  ;;  %4146 = vst [vmem:[#allocation63_spill] sm:$0xff] %v2884_v24 }
 0x10e   : > { %889 = vrot.lane.b32.xlu0 %v2866_v15, %s2262_s4  ;;  %v2872_v31 = vpop.permute.xlu2 %757  ;;  %v2898_v15 = vld [vmem:[#allocation2 + $0xc8] sm:$0xff] }
 0x10f   : > { %4141 = vst [vmem:[#allocation58_spill] sm:$0xff] %v2872_v31  ;;  %v2874_v23 = vpop.permute.xlu1 %673 }
 0x110   : > { %4142 = vst [vmem:[#allocation59_spill] sm:$0xff] %v2874_v23  ;;  %v2876_v43 = vpop.permute.xlu0 %741 }
 0x111   : > { %4143 = vst [vmem:[#allocation60_spill] sm:$0xff] %v2876_v43  ;;  %v2896_v43 = vld [vmem:[#allocation2 + $0xd8] sm:$0xff] }
 0x112   : > { %4150 = vst [vmem:[#allocation67_spill] sm:$0xff] %v2896_v43 }
 0x113   : > { %4151 = vst [vmem:[#allocation68_spill] sm:$0xff] %v2898_v15 }
 0x114   : > { %893 = vrot.lane.b32.xlu2 %v2878_v45, %s2262_s4  ;;  %v255_v45 = vld [vmem:[%s2405_s29 + $0xf0] sm:$0xff]  ;;  %s163_s29 = scalar_lea.vmem [#allocation3], %s2097_s24 }
 0x115   : > { %891 = vrot.lane.b32.xlu1 %v2880_v32, %s2262_s4  ;;  %288 = vst.msk [vmem:[#allocation2 + $0x181] sm:$0xff] %vm169_vm0, %v255_v45  ;;  %v2918_v32 = vld [vmem:[#allocation2 + $0xf8] sm:$0xff]  ;;  %s2031_s30 = sshll.u32 %s163_s29, 4  ;;  %s2032_s30 = int_to_ptr.vmem [resolvable:$true] %s2031_s30 }
 0x116   : > { %895 = vrot.lane.b32.xlu0 %v2884_v24, %s2262_s4  ;;  %v2890_v31 = vpop.permute.xlu2 %763  ;;  %4156 = vst [vmem:[#allocation73_spill] sm:$0xff] %v2918_v32  ;;  %v2974_v24 = vld [vmem:[#allocation2 + $0x158] sm:$0xff] }
 0x117   : > { %4147 = vst [vmem:[#allocation64_spill] sm:$0xff] %v2890_v31  ;;  %v2892_v14 = vpop.permute.xlu1 %743 }
 0x118   : > { %4148 = vst [vmem:[#allocation65_spill] sm:$0xff] %v2892_v14  ;;  %v2894_v23 = vpop.permute.xlu0 %747 }
 0x119   : > { %4149 = vst [vmem:[#allocation66_spill] sm:$0xff] %v2894_v23 }
 0x11a   : > { %4172 = vst [vmem:[#allocation89_spill] sm:$0xff] %v2974_v24 }
 0x11c   : > { %899 = vrot.lane.b32.xlu2 %v2896_v43, %s2262_s4  ;;  %v2920_v43 = vld [vmem:[#allocation2 + $0xf0] sm:$0xff] }
 0x11d   : > { %897 = vrot.lane.b32.xlu1 %v2898_v15, %s2262_s4  ;;  %4157 = vst [vmem:[#allocation74_spill] sm:$0xff] %v2920_v43  ;;  %v2924_v15 = vld [vmem:[#allocation2 + $0x108] sm:$0xff] }
 0x11e   : > { %901 = vrot.lane.b32.xlu0 %v2904_v22, %s2262_s4  ;;  %v2911_v31 = vpop.permute.xlu2 %769  ;;  %4158 = vst [vmem:[#allocation75_spill] sm:$0xff] %v2924_v15  ;;  %v2938_v22 = vld [vmem:[#allocation2 + $0x110] sm:$0xff] }
 0x11f   : > { %4153 = vst [vmem:[#allocation70_spill] sm:$0xff] %v2911_v31  ;;  %v2914_v14 = vpop.permute.xlu1 %749  ;;  %v2960_v31 = vld [vmem:[#allocation2 + $0x150] sm:$0xff] }
 0x120   : > { %4154 = vst [vmem:[#allocation71_spill] sm:$0xff] %v2914_v14  ;;  %v2916_v23 = vpop.permute.xlu0 %753 }
 0x121   : > { %4155 = vst [vmem:[#allocation72_spill] sm:$0xff] %v2916_v23  ;;  %v2936_v23 = vld [vmem:[#allocation2 + $0x120] sm:$0xff] }
 0x122   : > { %4162 = vst [vmem:[#allocation79_spill] sm:$0xff] %v2938_v22 }
 0x123   : > { %4169 = vst [vmem:[#allocation86_spill] sm:$0xff] %v2960_v31 }
 0x124   : > { %905 = vrot.lane.b32.xlu2 %v2918_v32, %s2262_s4  ;;  %v2942_v32 = vld [vmem:[#allocation2 + $0x128] sm:$0xff] }
 0x125   : > { %903 = vrot.lane.b32.xlu1 %v2920_v43, %s2262_s4  ;;  %4163 = vst [vmem:[#allocation80_spill] sm:$0xff] %v2942_v32 }
 0x126   : > { %907 = vrot.lane.b32.xlu0 %v2924_v15, %s2262_s4  ;;  %v2930_v44 = vpop.permute.xlu2 %775  ;;  %v2954_v15 = vld [vmem:[#allocation2 + $0x140] sm:$0xff] }
 0x127   : > { %4159 = vst [vmem:[#allocation76_spill] sm:$0xff] %v2930_v44  ;;  %v2932_v45 = vpop.permute.xlu1 %755  ;;  %v2956_v44 = vld [vmem:[#allocation2 + $0x138] sm:$0xff] }
 0x128   : > { %4160 = vst [vmem:[#allocation77_spill] sm:$0xff] %v2932_v45  ;;  %v2934_v14 = vpop.permute.xlu0 %759 }
 0x129   : > { %4161 = vst [vmem:[#allocation78_spill] sm:$0xff] %v2934_v14 }
 0x12a   : > { %4167 = vst [vmem:[#allocation84_spill] sm:$0xff] %v2954_v15 }
 0x12b   : > { %4168 = vst [vmem:[#allocation85_spill] sm:$0xff] %v2956_v44 }
 0x12c   : > { %911 = vrot.lane.b32.xlu2 %v2936_v23, %s2262_s4 }
 0x12d   : > { %909 = vrot.lane.b32.xlu1 %v2938_v22, %s2262_s4 }
 0x12e   : > { %913 = vrot.lane.b32.xlu0 %v2942_v32, %s2262_s4  ;;  %v2948_v43 = vpop.permute.xlu2 %781  ;;  %v2992_v32 = vld [vmem:[#allocation2 + $0x180] sm:$0xff] }
 0x12f   : > { %4164 = vst [vmem:[#allocation81_spill] sm:$0xff] %v2948_v43  ;;  %v2950_v45 = vpop.permute.xlu1 %761  ;;  %v2972_v43 = vld [vmem:[#allocation2 + $0x168] sm:$0xff] }
 0x130   : > { %4165 = vst [vmem:[#allocation82_spill] sm:$0xff] %v2950_v45  ;;  %v2952_v14 = vpop.permute.xlu0 %765 }
 0x131   : > { %4166 = vst [vmem:[#allocation83_spill] sm:$0xff] %v2952_v14 }
 0x132   : > { %4177 = vst [vmem:[#allocation94_spill] sm:$0xff] %v2992_v32 }
 0x134   : > { %917 = vrot.lane.b32.xlu2 %v2954_v15, %s2262_s4  ;;  %v2978_v15 = vld [vmem:[#allocation2 + $0x170] sm:$0xff] }
 0x135   : > { %915 = vrot.lane.b32.xlu1 %v2956_v44, %s2262_s4  ;;  %4173 = vst [vmem:[#allocation90_spill] sm:$0xff] %v2978_v15 }
 0x136   : > { %919 = vrot.lane.b32.xlu0 %v2960_v31, %s2262_s4  ;;  %v2966_v22 = vpop.permute.xlu2 %787  ;;  %v2990_v31 = vld [vmem:[#allocation2 + $0x188] sm:$0xff] }
 0x137   : > { %v2968_v45 = vpop.permute.xlu1 %767  ;;  %4176 = vst [vmem:[#allocation93_spill] sm:$0xff] %v2990_v31 }
 0x138   : > { %4170 = vst [vmem:[#allocation87_spill] sm:$0xff] %v2968_v45  ;;  %v2970_v14 = vpop.permute.xlu0 %771 }
 0x139   : > { %4171 = vst [vmem:[#allocation88_spill] sm:$0xff] %v2970_v14 }
 0x13c   : > { %923 = vrot.lane.b32.xlu2 %v2972_v43, %s2262_s4 }
 0x13d   : > { %921 = vrot.lane.b32.xlu1 %v2974_v24, %s2262_s4 }
 0x13e   : > { %925 = vrot.lane.b32.xlu0 %v2978_v15, %s2262_s4  ;;  %v2984_v44 = vpop.permute.xlu2 %793 }
 0x13f   : > { %v2986_v45 = vpop.permute.xlu1 %773 }
 0x140   : > { %4174 = vst [vmem:[#allocation91_spill] sm:$0xff] %v2986_v45  ;;  %v2988_v14 = vpop.permute.xlu0 %777 }
 0x141   : > { %4175 = vst [vmem:[#allocation92_spill] sm:$0xff] %v2988_v14 }
 0x144   : > { %929 = vrot.lane.b32.xlu2 %v2990_v31, %s2262_s4 }
 0x145   : > { %927 = vrot.lane.b32.xlu1 %v2992_v32, %s2262_s4  ;;  %s2033_s4 = sshll.u32 %s2029_s28, 4  ;;  %s2034_s4 = int_to_ptr.hbm [resolvable:$true] %s2033_s4 }
 0x146   : > { %v2998_v24 = vpop.permute.xlu2 %799  ;;  %995 = vrot.lane.b32.xlu0 %v2437_v5, %s2263_s5  ;;  %s2209_s16 = sshra.s32 %s2034_s4, 4  ;;  %s2210_s16 = int_to_ptr.hbm [resolvable:$true] %s2209_s16 }
 0x147   : > { %v3002_v15 = vpop.permute.xlu1 %779  ;;  %p2216_p0 = scmp.lt.s32.totalorder %s2210_s16, %s4040_s3 }
 0x148   : > { %v3004_v45 = vpop.permute.xlu0 %783 }
 0x14c   : > { %999 = vrot.lane.b32.xlu2 %v2431_v4, %s2263_s5 }
 0x14d   : > { %997 = vrot.lane.b32.xlu1 %v2489_v19, %s2263_s5 }
 0x14e   : > { %1001 = vrot.lane.b32.xlu0 %v2483_v17, %s2263_s5  ;;  %v3012_v32 = vpop.permute.xlu2 %869 }
 0x14f   : > { %v3014_v31 = vpop.permute.xlu1 %785 }
 0x150   : > { %v3016_v14 = vpop.permute.xlu0 %789 }
 0x154   : > { %1005 = vrot.lane.b32.xlu2 %v2511_v28, %s2263_s5 }
 0x155   : > { %1003 = vrot.lane.b32.xlu1 %v2495_v21, %s2263_s5 }
 0x156   : > { %1007 = vrot.lane.b32.xlu0 %v2507_v26, %s2263_s5  ;;  %v3024_v4 = vpop.permute.xlu2 %875 }
 0x157   : > { %v3026_v5 = vpop.permute.xlu1 %791 }
 0x158   : > { %v3028_v17 = vpop.permute.xlu0 %795 }
 0x15c   : > { %1011 = vrot.lane.b32.xlu2 %v2534_v35, %s2263_s5 }
 0x15d   : > { %1009 = vrot.lane.b32.xlu1 %v2515_v30, %s2263_s5 }
 0x15e   : > { %1013 = vrot.lane.b32.xlu0 %v2532_v34, %s2263_s5  ;;  %v3036_v19 = vpop.permute.xlu2 %881 }
 0x15f   : > { %v3038_v21 = vpop.permute.xlu1 %797 }
 0x160   : > { %v3040_v26 = vpop.permute.xlu0 %801 }
 0x164   : > { %1017 = vrot.lane.b32.xlu2 %v2552_v41, %s2263_s5 }
 0x165   : > { %1015 = vrot.lane.b32.xlu1 %v2536_v36, %s2263_s5 }
 0x166   : > { %1019 = vrot.lane.b32.xlu0 %v2550_v40, %s2263_s5  ;;  %v3048_v28 = vpop.permute.xlu2 %887 }
 0x167   : > { %4178 = vst [vmem:[#allocation95_spill] sm:$0xff] %v3048_v28  ;;  %v3050_v30 = vpop.permute.xlu1 %867  ;;  %v4211_v28 = vld [vmem:[#allocation37_spill] sm:$0xff] }
 0x168   : > { %4179 = vst [vmem:[#allocation96_spill] sm:$0xff] %v3050_v30  ;;  %v3052_v34 = vpop.permute.xlu0 %871 }
 0x169   : > { %4180 = vst [vmem:[#allocation97_spill] sm:$0xff] %v3052_v34 }
 0x16c   : > { %1023 = vrot.lane.b32.xlu2 %v2570_v47, %s2263_s5 }
 0x16d   : > { %1021 = vrot.lane.b32.xlu1 %v2554_v42, %s2263_s5 }
 0x16e   : > { %1025 = vrot.lane.b32.xlu0 %v2568_v46, %s2263_s5  ;;  %v3060_v35 = vpop.permute.xlu2 %893 }
 0x16f   : > { %4181 = vst [vmem:[#allocation98_spill] sm:$0xff] %v3060_v35  ;;  %v3062_v36 = vpop.permute.xlu1 %873 }
 0x170   : > { %v3064_v40 = vpop.permute.xlu0 %877 }
 0x171   : > { %4182 = vst [vmem:[#allocation99_spill] sm:$0xff] %v3064_v40  ;;  %v4207_v40 = vld [vmem:[#allocation42_spill] sm:$0xff] }
 0x174   : > { %1029 = vrot.lane.b32.xlu2 %v2584_v51, %s2263_s5 }
 0x175   : > { %1027 = vrot.lane.b32.xlu1 %v2572_v48, %s2263_s5 }
 0x176   : > { %1031 = vrot.lane.b32.xlu0 %v2582_v50, %s2263_s5  ;;  %v3072_v41 = vpop.permute.xlu2 %899 }
 0x177   : > { %v3074_v42 = vpop.permute.xlu1 %879 }
 0x178   : > { %4183 = vst [vmem:[#allocation100_spill] sm:$0xff] %v3074_v42  ;;  %v3076_v46 = vpop.permute.xlu0 %883  ;;  %v484_v42 = vld [vmem:[#allocation2 + $0x38] sm:$0xff] }
 0x179   : > { %4184 = vst [vmem:[#allocation101_spill] sm:$0xff] %v3076_v46 }
 0x17c   : > { %1035 = vrot.lane.b32.xlu2 %v2596_v54, %s2263_s5 }
 0x17d   : > { %1033 = vrot.lane.b32.xlu1 %v2586_v52, %s2263_s5 }
 0x17e   : > { %1037 = vrot.lane.b32.xlu0 %v2594_v53, %s2263_s5  ;;  %v3084_v47 = vpop.permute.xlu2 %905 }
 0x17f   : > { %v3086_v48 = vpop.permute.xlu1 %885 }
 0x180   : > { %4185 = vst [vmem:[#allocation102_spill] sm:$0xff] %v3086_v48  ;;  %v3088_v50 = vpop.permute.xlu0 %889  ;;  %v4202_v48 = vld [vmem:[#allocation32_spill] sm:$0xff] }
 0x181   : > { %4186 = vst [vmem:[#allocation103_spill] sm:$0xff] %v3088_v50 }
 0x184   : > { %1041 = vrot.lane.b32.xlu2 %v2608_v57, %s2263_s5  ;;  %v3114_v57 = vld [vmem:[#allocation2 + $0x181] sm:$0xff] }
 0x185   : > { %1039 = vrot.lane.b32.xlu1 %v2598_v55, %s2263_s5 }
 0x186   : > { %1043 = vrot.lane.b32.xlu0 %v2606_v56, %s2263_s5  ;;  %v3096_v51 = vpop.permute.xlu2 %911 }
 0x187   : > { %v3098_v52 = vpop.permute.xlu1 %891 }
 0x188   : > { %4187 = vst [vmem:[#allocation104_spill] sm:$0xff] %v3098_v52  ;;  %v3100_v53 = vpop.permute.xlu0 %895  ;;  %v3128_v52 = vld [vmem:[#allocation2 + $0x189] sm:$0xff] }
 0x18c   : > { %1047 = vrot.lane.b32.xlu2 %v2620_v60, %s2263_s5 }
 0x18d   : > { %1045 = vrot.lane.b32.xlu1 %v2610_v58, %s2263_s5 }
 0x18e   : > { %1049 = vrot.lane.b32.xlu0 %v2618_v59, %s2263_s5  ;;  %v3108_v54 = vpop.permute.xlu2 %917 }
 0x18f   : > { %v3110_v55 = vpop.permute.xlu1 %897 }
 0x190   : > { %v3112_v56 = vpop.permute.xlu0 %901 }
 0x194   : > { %1053 = vrot.lane.b32.xlu2 %v2630_v63, %s2263_s5 }
 0x195   : > { %1051 = vrot.lane.b32.xlu1 %v2622_v61, %s2263_s5 }
 0x196   : > { %1055 = vrot.lane.b32.xlu0 %v3114_v57, %s2263_s5  ;;  %v3122_v58 = vpop.permute.xlu2 %923 }
 0x197   : > { %v3124_v59 = vpop.permute.xlu1 %903 }
 0x198   : > { %v3126_v60 = vpop.permute.xlu0 %907 }
 0x19c   : > { %1123 = vrot.lane.b32.xlu2 %v2638_v2, %s2264_s6 }
 0x19d   : > { %1057 = vrot.lane.b32.xlu1 %v3128_v52, %s2263_s5  ;;  %s2018_s5 = scalar_lea.sflag [#allocation4], %s161_s20 }
 0x19e   : > { %1125 = vrot.lane.b32.xlu0 %v2636_v1, %s2264_s6  ;;  %v3136_v61 = vpop.permute.xlu2 %929 }
 0x19f   : > { %4188 = vst [vmem:[#allocation105_spill] sm:$0xff] %v3136_v61  ;;  %v3138_v63 = vpop.permute.xlu1 %909 }
 0x1a0   : > { %v3140_v35 = vpop.permute.xlu0 %913 }
 0x1a4   : > { %1129 = vrot.lane.b32.xlu2 %v2652_v8, %s2264_s6 }
 0x1a5   : > { %1127 = vrot.lane.b32.xlu1 %v2640_v3, %s2264_s6 }
 0x1a6   : > { %1131 = vrot.lane.b32.xlu0 %v2650_v7, %s2264_s6  ;;  %v3148_v2 = vpop.permute.xlu2 %999 }
 0x1a7   : > { %4189 = vst [vmem:[#allocation106_spill] sm:$0xff] %v3148_v2  ;;  %v3150_v50 = vpop.permute.xlu1 %915  ;;  %v4208_v2 = vld [vmem:[#allocation43_spill] sm:$0xff] }
 0x1a8   : > { %v3152_v1 = vpop.permute.xlu0 %919 }
 0x1ac   : > { %1135 = vrot.lane.b32.xlu2 %v2666_v12, %s2264_s6 }
 0x1ad   : > { %1133 = vrot.lane.b32.xlu1 %v2654_v9, %s2264_s6 }
 0x1ae   : > { %1137 = vrot.lane.b32.xlu0 %v2664_v11, %s2264_s6  ;;  %v3160_v8 = vpop.permute.xlu2 %1005 }
 0x1af   : > { %4190 = vst [vmem:[#allocation107_spill] sm:$0xff] %v3160_v8  ;;  %v3162_v3 = vpop.permute.xlu1 %921  ;;  %v483_v8 = vld [vmem:[#allocation2 + $0x30] sm:$0xff] }
 0x1b0   : > { %v3164_v7 = vpop.permute.xlu0 %925 }
 0x1b1   : > { %4191 = vst [vmem:[#allocation108_spill] sm:$0xff] %v3164_v7 }
 0x1b4   : > { %1141 = vrot.lane.b32.xlu2 %v2682_v18, %s2264_s6 }
 0x1b5   : > { %1139 = vrot.lane.b32.xlu1 %v2668_v13, %s2264_s6 }
 0x1b6   : > { %1143 = vrot.lane.b32.xlu0 %v2680_v16, %s2264_s6  ;;  %v3172_v12 = vpop.permute.xlu2 %1011 }
 0x1b7   : > { %4192 = vst [vmem:[#allocation109_spill] sm:$0xff] %v3172_v12  ;;  %v3174_v9 = vpop.permute.xlu1 %927 }
 0x1b8   : > { %v3176_v11 = vpop.permute.xlu0 %995 }
 0x1b9   : > { %4193 = vst [vmem:[#allocation110_spill] sm:$0xff] %v3176_v11 }
 0x1bc   : > { %1147 = vrot.lane.b32.xlu2 %v2700_v27, %s2264_s6 }
 0x1bd   : > { %1145 = vrot.lane.b32.xlu1 %v2684_v20, %s2264_s6 }
 0x1be   : > { %1149 = vrot.lane.b32.xlu0 %v2698_v25, %s2264_s6  ;;  %v3184_v18 = vpop.permute.xlu2 %1017 }
 0x1bf   : > { %4194 = vst [vmem:[#allocation111_spill] sm:$0xff] %v3184_v18  ;;  %v3186_v13 = vpop.permute.xlu1 %997  ;;  %v4199_v18 = vld [vmem:[#allocation22_spill] sm:$0xff] }
 0x1c0   : > { %v3188_v16 = vpop.permute.xlu0 %1001 }
 0x1c4   : > { %1153 = vrot.lane.b32.xlu2 %v2718_v38, %s2264_s6 }
 0x1c5   : > { %1151 = vrot.lane.b32.xlu1 %v2702_v29, %s2264_s6 }
 0x1c6   : > { %1155 = vrot.lane.b32.xlu0 %v2716_v37, %s2264_s6  ;;  %v3196_v27 = vpop.permute.xlu2 %1023 }
 0x1c7   : > { %v3198_v20 = vpop.permute.xlu1 %1003 }
 0x1c8   : > { %v3200_v25 = vpop.permute.xlu0 %1007 }
 0x1c9   : > { %4195 = vst [vmem:[#allocation112_spill] sm:$0xff] %v3200_v25  ;;  %v3250_v25 = vld [vmem:[#allocation2 + $0x182] sm:$0xff] }
 0x1cc   : > { %1159 = vrot.lane.b32.xlu2 %v2736_v62, %s2264_s6 }
 0x1cd   : > { %1157 = vrot.lane.b32.xlu1 %v2720_v39, %s2264_s6 }
 0x1ce   : > { %1161 = vrot.lane.b32.xlu0 %v2734_v49, %s2264_s6  ;;  %v3208_v38 = vpop.permute.xlu2 %1029 }
 0x1cf   : > { %v3210_v29 = vpop.permute.xlu1 %1009 }
 0x1d0   : > { %v3212_v37 = vpop.permute.xlu0 %1013 }
 0x1d1   : > { %4196 = vst [vmem:[#allocation113_spill] sm:$0xff] %v3212_v37 }
 0x1d4   : > { %1165 = vrot.lane.b32.xlu2 %v2754_v10, %s2264_s6  ;;  %v4200_v10 = vld [vmem:[#allocation26_spill] sm:$0xff] }
 0x1d5   : > { %1163 = vrot.lane.b32.xlu1 %v2738_v0, %s2264_s6 }
 0x1d6   : > { %1167 = vrot.lane.b32.xlu0 %v2752_v33, %s2264_s6  ;;  %v3220_v62 = vpop.permute.xlu2 %1035 }
 0x1d7   : > { %v3222_v39 = vpop.permute.xlu1 %1015 }
 0x1d8   : > { %4197 = vst [vmem:[#allocation114_spill] sm:$0xff] %v3222_v39  ;;  %v3224_v49 = vpop.permute.xlu0 %1019 }
 0x1d9   : > { %4198 = vst [vmem:[#allocation115_spill] sm:$0xff] %v3224_v49  ;;  %v4203_v49 = vld [vmem:[#allocation27_spill] sm:$0xff] }
 0x1dc   : > { %1171 = vrot.lane.b32.xlu2 %v2772_v6, %s2264_s6  ;;  %v4204_v6 = vld [vmem:[#allocation31_spill] sm:$0xff] }
 0x1dd   : > { %1169 = vrot.lane.b32.xlu1 %v4199_v18, %s2264_s6 }
 0x1de   : > { %1173 = vrot.lane.b32.xlu0 %v4200_v10, %s2264_s6  ;;  %v3232_v37 = vpop.permute.xlu2 %1041 }
 0x1df   : > { %v3234_v0 = vpop.permute.xlu1 %1021 }
 0x1e0   : > { %4201 = vst [vmem:[#allocation22_spill] sm:$0xff] %v3234_v0  ;;  %v3236_v33 = vpop.permute.xlu0 %1025  ;;  %v3252_v0 = vld [vmem:[#allocation2 + $0x18a] sm:$0xff] }
 0x1e4   : > { %1177 = vrot.lane.b32.xlu2 %v4202_v48, %s2264_s6  ;;  %v4205_v48 = vld [vmem:[#allocation33_spill] sm:$0xff] }
 0x1e5   : > { %1175 = vrot.lane.b32.xlu1 %v4203_v49, %s2264_s6 }
 0x1e6   : > { %1179 = vrot.lane.b32.xlu0 %v4204_v6, %s2264_s6  ;;  %v3244_v12 = vpop.permute.xlu2 %1047 }
 0x1e7   : > { %v3246_v18 = vpop.permute.xlu1 %1027 }
 0x1e8   : > { %v3248_v10 = vpop.permute.xlu0 %1031 }
 0x1ec   : > { %1183 = vrot.lane.b32.xlu2 %v3250_v25, %s2264_s6 }
 0x1ed   : > { %1181 = vrot.lane.b32.xlu1 %v4205_v48, %s2264_s6  ;;  %v1627_v48 = vsel %vm169_vm0, %v2936_v23, %v4207_v40  ;;  %v487_v23 = vld [vmem:[#allocation2 + $0x60] sm:$0xff]  ;;  %v4210_v40 = vld [vmem:[#allocation14_spill] sm:$0xff] }
 0x1ee   : > { %1185 = vrot.lane.b32.xlu0 %v3252_v0, %s2264_s6  ;;  %v3260_v49 = vpop.permute.xlu2 %1053  ;;  %v1660_v34 = vsel %vm1635_vm2, %v1627_v48, %v2966_v22  ;;  %v4213_v22 = vld [vmem:[#allocation47_spill] sm:$0xff]  ;;  %v4214_v48 = vld [vmem:[#allocation80_spill] sm:$0xff]  ;;  %s2211_s6 = scalar_lea.hbm %s2210_s16, 16 }
 0x1ef   : > { %4206 = vst [vmem:[#allocation26_spill] sm:$0xff] %v3260_v49  ;;  %v3262_v6 = vpop.permute.xlu1 %1033  ;;  %v1628_v61 = vsel %vm169_vm0, %v4214_v48, %v4213_v22  ;;  %p2212_p11 = scmp.ne.s32.totalorder %s2210_s16, %s2211_s6 }
 0x1f0   : > { %v3264_v46 = vpop.permute.xlu0 %1037 }
 0x1f1   : > { %p2213_p12 = pnand %p2212_p11, %p2327_p5 }
 0x1f3   : > { %p2214_p13 = pneg %p2213_p12 }
 0x1f4   : > { %1253 = vrot.lane.b32.xlu2 %v484_v42, %s2265_s7  ;;  %v1693_v42 = vsel %vm1668_vm3, %v1660_v34, %v3150_v50  ;;  %v4215_v50 = vld [vmem:[#allocation45_spill] sm:$0xff] }
 0x1f5   : > { %1251 = vrot.lane.b32.xlu1 %v483_v8, %s2265_s7 }
 0x1f6   : > { %1255 = vrot.lane.b32.xlu0 %v4208_v2, %s2265_s7  ;;  %v3273_v11 = vpop.permute.xlu2 %1123  ;;  %v1606_v2 = vsel %vm169_vm0, %v4211_v28, %v4210_v40  ;;  %v1661_v28 = vsel %vm1635_vm2, %v1628_v61, %v3016_v14 }
 0x1f7   : > { %4209 = vst [vmem:[#allocation32_spill] sm:$0xff] %v3273_v11  ;;  %v3277_v39 = vpop.permute.xlu1 %1039  ;;  %v4212_v11 = vld [vmem:[#allocation46_spill] sm:$0xff] }
 0x1f8   : > { %v1044_v8 = vpop.permute.xlu0 %1043  ;;  %v1639_v49 = vsel %vm1635_vm2, %v1606_v2, %v4212_v11  ;;  %v4218_v11 = vld [vmem:[#allocation49_spill] sm:$0xff] }
 0x1f9   : > { %v3282_v30 = vsel %vm1701_vm4, %v1693_v42, %v1044_v8  ;;  %v1672_v34 = vsel %vm1668_vm3, %v1639_v49, %v3062_v36  ;;  %v4216_v42 = vld [vmem:[#allocation48_spill] sm:$0xff]  ;;  %v1694_v49 = vsel %vm1668_vm3, %v1661_v28, %v3108_v54 }
 0x1fa   : > { %v4217_v8 = vld [vmem:[#allocation84_spill] sm:$0xff]  ;;  %v1705_v2 = vsel %vm1701_vm4, %v1672_v34, %v3188_v16 }
 0x1fb   : > { %v1630_v7 = vsel %vm169_vm0, %v4217_v8, %v4216_v42  ;;  %v490_v34 = vld [vmem:[#allocation2 + $0x80] sm:$0xff]  ;;  %v4222_v42 = vld [vmem:[#allocation51_spill] sm:$0xff]  ;;  %v4223_v8 = vld [vmem:[#allocation54_spill] sm:$0xff] }
 0x1fc   : > { %1259 = vrot.lane.b32.xlu2 %v487_v23, %s2265_s7  ;;  %v1663_v36 = vsel %vm1635_vm2, %v1630_v7, %v2984_v44  ;;  %v4220_v44 = vld [vmem:[#allocation53_spill] sm:$0xff]  ;;  %v4221_v7 = vld [vmem:[#allocation86_spill] sm:$0xff] }
 0x1fd   : > { %1257 = vrot.lane.b32.xlu1 %v4215_v50, %s2265_s7  ;;  %v1696_v14 = vsel %vm1668_vm3, %v1663_v36, %v3162_v3  ;;  %v1631_v54 = vsel %vm169_vm0, %v4221_v7, %v4220_v44  ;;  %v1633_v3 = vsel %vm169_vm0, %v2972_v43, %v4223_v8  ;;  %v496_v7 = vld [vmem:[#allocation2 + $0xc8] sm:$0xff]  ;;  %v4230_v8 = vld [vmem:[#allocation67_spill] sm:$0xff] }
 0x1fe   : > { %1261 = vrot.lane.b32.xlu0 %v4218_v11, %s2265_s7  ;;  %v1130_v23 = vpop.permute.xlu2 %1129  ;;  %v1664_v28 = vsel %vm1635_vm2, %v1631_v54, %v3028_v17  ;;  %v4229_v54 = vld [vmem:[#allocation63_spill] sm:$0xff] }
 0x1ff   : > { %v3311_v40 = vsel %vm1734_vm5, %v1705_v2, %v1130_v23  ;;  %v1046_v22 = vpop.permute.xlu1 %1045  ;;  %v4224_v2 = vld [vmem:[#allocation55_spill] sm:$0xff]  ;;  %v1666_v23 = vsel %vm1635_vm2, %v1633_v3, %v2998_v24  ;;  %v1697_v36 = vsel %vm1668_vm3, %v1664_v28, %v3122_v58  ;;  %v4227_v24 = vld [vmem:[#allocation61_spill] sm:$0xff] }
 0x200   : > { %4219 = vst [vmem:[#allocation27_spill] sm:$0xff] %v3311_v40  ;;  %v3316_v61 = vsel %vm1701_vm4, %v1694_v49, %v1046_v22  ;;  %v1050_v16 = vpop.permute.xlu0 %1049  ;;  %v1699_v22 = vsel %vm1668_vm3, %v1666_v23, %v3174_v9  ;;  %v499_v23 = vld [vmem:[#allocation2 + $0xf0] sm:$0xff]  ;;  %v4241_v40 = vld [vmem:[#allocation36_spill] sm:$0xff] }
 0x201   : > { %v3319_v48 = vsel %vm1701_vm4, %v1696_v14, %v1050_v16  ;;  %v493_v16 = vld [vmem:[#allocation2 + $0xa8] sm:$0xff] }
 0x204   : > { %1265 = vrot.lane.b32.xlu2 %v490_v34, %s2265_s7  ;;  %v4226_v34 = vld [vmem:[#allocation57_spill] sm:$0xff] }
 0x205   : > { %1263 = vrot.lane.b32.xlu1 %v4222_v42, %s2265_s7 }
 0x206   : > { %1267 = vrot.lane.b32.xlu0 %v4224_v2, %s2265_s7  ;;  %v3334_v11 = vpop.permute.xlu2 %1135 }
 0x207   : > { %4225 = vst [vmem:[#allocation31_spill] sm:$0xff] %v3334_v11  ;;  %v1052_v49 = vpop.permute.xlu1 %1051  ;;  %v4239_v11 = vld [vmem:[#allocation76_spill] sm:$0xff] }
 0x208   : > { %v3343_v43 = vsel %vm1701_vm4, %v1697_v36, %v1052_v49  ;;  %v1056_v14 = vpop.permute.xlu0 %1055  ;;  %v4232_v36 = vld [vmem:[#allocation25_spill] sm:$0xff] }
 0x209   : > { %v3346_v17 = vsel %vm1701_vm4, %v1699_v22, %v1056_v14  ;;  %v1618_v49 = vsel %vm169_vm0, %v4227_v24, %v4232_v36  ;;  %v4233_v22 = vld [vmem:[#allocation70_spill] sm:$0xff] }
 0x20a   : > { %v1651_v14 = vsel %vm1635_vm2, %v1618_v49, %v4233_v22  ;;  %v4238_v22 = vld [vmem:[#allocation30_spill] sm:$0xff] }
 0x20c   : > { %1271 = vrot.lane.b32.xlu2 %v493_v16, %s2265_s7  ;;  %v1684_v16 = vsel %vm1668_vm3, %v1651_v14, %v3110_v55  ;;  %v1621_v55 = vsel %vm169_vm0, %v4230_v8, %v4238_v22  ;;  %v514_v14 = vld [vmem:[#allocation2 + $0x1a0] sm:$0xff] }
 0x20d   : > { %1269 = vrot.lane.b32.xlu1 %v4226_v34, %s2265_s7  ;;  %v4234_v34 = vld [vmem:[#allocation69_spill] sm:$0xff] }
 0x20e   : > { %1273 = vrot.lane.b32.xlu0 %v4227_v24, %s2265_s7  ;;  %v3353_v58 = vpop.permute.xlu2 %1141 }
 0x20f   : > { %4228 = vst [vmem:[#allocation33_spill] sm:$0xff] %v3353_v58  ;;  %v3355_v44 = vpop.permute.xlu1 %1057 }
 0x210   : > { %v3357_v9 = vpop.permute.xlu0 %1125 }
 0x214   : > { %1277 = vrot.lane.b32.xlu2 %v496_v7, %s2265_s7  ;;  %v1717_v7 = vsel %vm1701_vm4, %v1684_v16, %v3236_v33  ;;  %v1654_v33 = vsel %vm1635_vm2, %v1621_v55, %v4239_v11  ;;  %v530_v55 = vld [vmem:[#allocation2 + $0xe1] sm:$0xff] }
 0x215   : > { %1275 = vrot.lane.b32.xlu1 %v4229_v54, %s2265_s7  ;;  %v1687_v16 = vsel %vm1668_vm3, %v1654_v33, %v3124_v59  ;;  %v562_v33 = vld [vmem:[#allocation2 + $0xe2] sm:$0xff] }
 0x216   : > { %1279 = vrot.lane.b32.xlu0 %v4230_v8, %s2265_s7  ;;  %v3364_v3 = vpop.permute.xlu2 %1147 }
 0x217   : > { %4231 = vst [vmem:[#allocation42_spill] sm:$0xff] %v3364_v3  ;;  %v3366_v28 = vpop.permute.xlu1 %1127  ;;  %v4235_v3 = vld [vmem:[#allocation73_spill] sm:$0xff] }
 0x218   : > { %v3368_v2 = vpop.permute.xlu0 %1131  ;;  %v1624_v59 = vsel %vm169_vm0, %v4235_v3, %v4241_v40 }
 0x21c   : > { %1283 = vrot.lane.b32.xlu2 %v499_v23, %s2265_s7  ;;  %v502_v23 = vld [vmem:[#allocation2 + $0x110] sm:$0xff] }
 0x21d   : > { %1281 = vrot.lane.b32.xlu1 %v4234_v34, %s2265_s7 }
 0x21e   : > { %1285 = vrot.lane.b32.xlu0 %v4235_v3, %s2265_s7  ;;  %v1154_v58 = vpop.permute.xlu2 %1153 }
 0x21f   : > { %v3385_v24 = vsel %vm1734_vm5, %v1717_v7, %v1154_v58  ;;  %v3387_v36 = vpop.permute.xlu1 %1133  ;;  %v4240_v58 = vld [vmem:[#allocation75_spill] sm:$0xff]  ;;  %v1720_v7 = vsel %vm1701_vm4, %v1687_v16, %v3248_v10 }
 0x220   : > { %4236 = vst [vmem:[#allocation14_spill] sm:$0xff] %v3385_v24  ;;  %v3389_v49 = vpop.permute.xlu0 %1137 }
 0x221   : > { %4237 = vst [vmem:[#allocation37_spill] sm:$0xff] %v3387_v36  ;;  %v4242_v36 = vld [vmem:[#allocation81_spill] sm:$0xff] }
 0x222   : > { %v1657_v10 = vsel %vm1635_vm2, %v1624_v59, %v4242_v36  ;;  %v529_v59 = vld [vmem:[#allocation2 + $0xd9] sm:$0xff] }
 0x224   : > { %1289 = vrot.lane.b32.xlu2 %v502_v23, %s2265_s7  ;;  %v546_v23 = vld [vmem:[#allocation2 + $0x1a1] sm:$0xff] }
 0x225   : > { %1287 = vrot.lane.b32.xlu1 %v4240_v58, %s2265_s7 }
 0x226   : > { %1313 = vrot.lane.b32.xlu0 %v514_v14, %s2265_s7  ;;  %v1160_v24 = vpop.permute.xlu2 %1159 }
 0x227   : > { %v3405_v8 = vsel %vm1734_vm5, %v1720_v7, %v1160_v24  ;;  %v3407_v22 = vpop.permute.xlu1 %1139  ;;  %v1690_v24 = vsel %vm1668_vm3, %v1657_v10, %v3138_v63  ;;  %v513_v7 = vld [vmem:[#allocation2 + $0x198] sm:$0xff]  ;;  %v4245_v63 = vld [vmem:[#allocation13_spill] sm:$0xff]  ;;  %v4246_v10 = vld [vmem:[#allocation62_spill] sm:$0xff] }
 0x228   : > { %v3409_v11 = vpop.permute.xlu0 %1143  ;;  %v1723_v14 = vsel %vm1701_vm4, %v1690_v24, %v3264_v46  ;;  %v4247_v46 = vld [vmem:[#allocation29_spill] sm:$0xff]  ;;  %v4248_v24 = vld [vmem:[#allocation87_spill] sm:$0xff] }
 0x22c   : > { %1441 = vrot.lane.b32.xlu2 %v546_v23, %s2266_s8  ;;  %v578_v23 = vld [vmem:[#allocation2 + $0x1a2] sm:$0xff] }
 0x22d   : > { %1409 = vrot.lane.b32.xlu1 %v530_v55, %s2266_s8  ;;  %v1617_v55 = vsel %vm169_vm0, %v4246_v10, %v4245_v63 }
 0x22e   : > { %1537 = vrot.lane.b32.xlu0 %v562_v33, %s2267_s9  ;;  %v1166_v16 = vpop.permute.xlu2 %1165  ;;  %v1619_v33 = vsel %vm169_vm0, %v4229_v54, %v4247_v46 }
 0x22f   : > { %v3424_v40 = vsel %vm1734_vm5, %v1723_v14, %v1166_v16  ;;  %v3426_v3 = vpop.permute.xlu1 %1145  ;;  %v1650_v14 = vsel %vm1635_vm2, %v1617_v55, %v4248_v24  ;;  %v4249_v16 = vld [vmem:[#allocation88_spill] sm:$0xff] }
 0x230   : > { %4243 = vst [vmem:[#allocation46_spill] sm:$0xff] %v3424_v40  ;;  %v3428_v36 = vpop.permute.xlu0 %1149  ;;  %v1652_v40 = vsel %vm1635_vm2, %v1619_v33, %v4249_v16  ;;  %v561_v33 = vld [vmem:[#allocation2 + $0xda] sm:$0xff] }
 0x231   : > { %4244 = vst [vmem:[#allocation47_spill] sm:$0xff] %v3428_v36  ;;  %v1683_v36 = vsel %vm1668_vm3, %v1650_v14, %v3100_v53  ;;  %v4250_v24 = vld [vmem:[#allocation16_spill] sm:$0xff]  ;;  %v4253_v14 = vld [vmem:[#allocation91_spill] sm:$0xff] }
 0x232   : > { %v1716_v54 = vsel %vm1701_vm4, %v1683_v36, %v3196_v27  ;;  %v4251_v27 = vld [vmem:[#allocation68_spill] sm:$0xff] }
 0x233   : > { %v1620_v36 = vsel %vm169_vm0, %v4251_v27, %v4250_v24  ;;  %v528_v27 = vld [vmem:[#allocation2 + $0xc9] sm:$0xff] }
 0x234   : > { %1311 = vrot.lane.b32.xlu2 %v513_v7, %s2265_s7  ;;  %v1685_v7 = vsel %vm1668_vm3, %v1652_v40, %v3072_v41  ;;  %v545_v41 = vld [vmem:[#allocation2 + $0x199] sm:$0xff]  ;;  %v1653_v16 = vsel %vm1635_vm2, %v1620_v36, %v4253_v14  ;;  %v4256_v36 = vld [vmem:[#allocation74_spill] sm:$0xff] }
 0x235   : > { %1569 = vrot.lane.b32.xlu1 %v578_v23, %s2267_s9  ;;  %v1718_v55 = vsel %vm1701_vm4, %v1685_v7, %v3246_v18  ;;  %v577_v40 = vld [vmem:[#allocation2 + $0x19a] sm:$0xff] }
 0x236   : > { %1407 = vrot.lane.b32.xlu0 %v529_v59, %s2266_s8  ;;  %v1172_v63 = vpop.permute.xlu2 %1171 }
 0x237   : > { %v3451_v10 = vsel %vm1734_vm5, %v3282_v30, %v1172_v63  ;;  %v1152_v23 = vpop.permute.xlu1 %1151  ;;  %v4252_v30 = vld [vmem:[#allocation35_spill] sm:$0xff]  ;;  %v4254_v63 = vld [vmem:[#allocation92_spill] sm:$0xff] }
 0x238   : > { %v3456_v46 = vsel %vm1734_vm5, %v1716_v54, %v1152_v23  ;;  %v1156_v53 = vpop.permute.xlu0 %1155  ;;  %v1622_v18 = vsel %vm169_vm0, %v4234_v34, %v4252_v30  ;;  %v1686_v54 = vsel %vm1668_vm3, %v1653_v16, %v3112_v56 }
 0x239   : > { %v3459_v59 = vsel %vm1734_vm5, %v1718_v55, %v1156_v53  ;;  %v1655_v7 = vsel %vm1635_vm2, %v1622_v18, %v4254_v63  ;;  %v1719_v34 = vsel %vm1701_vm4, %v1686_v54, %v3208_v38  ;;  %v4258_v18 = vld [vmem:[#allocation93_spill] sm:$0xff] }
 0x23a   : > { %v1688_v55 = vsel %vm1668_vm3, %v1655_v7, %v3084_v47  ;;  %v4255_v47 = vld [vmem:[#allocation19_spill] sm:$0xff]  ;;  %v291_v7 = vld [vmem:[#allocation2 + $0x8] sm:$0xff] }
 0x23b   : > { %v1623_v38 = vsel %vm169_vm0, %v4256_v36, %v4255_v47 }
 0x23c   : > { %1535 = vrot.lane.b32.xlu2 %v561_v33, %s2267_s9 }
 0x23d   : > { %1439 = vrot.lane.b32.xlu1 %v545_v41, %s2266_s8  ;;  %v1721_v41 = vsel %vm1701_vm4, %v1688_v55, %v3262_v6  ;;  %v1656_v6 = vsel %vm1635_vm2, %v1623_v38, %v3002_v15 }
 0x23e   : > { %1567 = vrot.lane.b32.xlu0 %v577_v40, %s2267_s9  ;;  %v1178_v23 = vpop.permute.xlu2 %1177  ;;  %v1689_v16 = vsel %vm1668_vm3, %v1656_v6, %v3126_v60 }
 0x23f   : > { %v3482_v53 = vsel %vm1734_vm5, %v3319_v48, %v1178_v23  ;;  %v1158_v33 = vpop.permute.xlu1 %1157  ;;  %v4257_v48 = vld [vmem:[#allocation41_spill] sm:$0xff]  ;;  %v1722_v15 = vsel %vm1701_vm4, %v1689_v16, %v3220_v62  ;;  %v4260_v62 = vld [vmem:[#allocation60_spill] sm:$0xff] }
 0x240   : > { %v3487_v24 = vsel %vm1734_vm5, %v1719_v34, %v1158_v33  ;;  %v1162_v56 = vpop.permute.xlu0 %1161  ;;  %v1625_v30 = vsel %vm169_vm0, %v4240_v58, %v4257_v48  ;;  %v4259_v34 = vld [vmem:[#allocation12_spill] sm:$0xff]  ;;  %v560_v33 = vld [vmem:[#allocation2 + $0xca] sm:$0xff] }
 0x241   : > { %v3490_v40 = vsel %vm1734_vm5, %v1721_v41, %v1162_v56  ;;  %v1658_v14 = vsel %vm1635_vm2, %v1625_v30, %v3004_v45  ;;  %v4262_v56 = vld [vmem:[#allocation79_spill] sm:$0xff] }
 0x242   : > { %v1691_v58 = vsel %vm1668_vm3, %v1658_v14, %v3096_v51  ;;  %v1604_v51 = vsel %vm169_vm0, %v291_v7, %v4259_v34  ;;  %v4265_v14 = vld [vmem:[#allocation39_spill] sm:$0xff]  ;;  %v4266_v7 = vld [vmem:[#allocation66_spill] sm:$0xff] }
 0x243   : > { %v1724_v45 = vsel %vm1701_vm4, %v1691_v58, %v3277_v39  ;;  %v1637_v41 = vsel %vm1635_vm2, %v1604_v51, %v4260_v62  ;;  %v559_v58 = vld [vmem:[#allocation2 + $0xc2] sm:$0xff] }
 0x244   : > { %1405 = vrot.lane.b32.xlu2 %v528_v27, %s2266_s8  ;;  %v1670_v39 = vsel %vm1668_vm3, %v1637_v41, %v3012_v32  ;;  %v4263_v32 = vld [vmem:[#allocation94_spill] sm:$0xff] }
 0x245   : > { %1309 = vrot.lane.b32.xlu1 %v4258_v18, %s2265_s7  ;;  %v1703_v36 = vsel %vm1701_vm4, %v1670_v39, %v3186_v13  ;;  %v4271_v39 = vld [vmem:[#allocation34_spill] sm:$0xff] }
 0x246   : > { %1437 = vrot.lane.b32.xlu0 %v3128_v52, %s2266_s8  ;;  %v1184_v63 = vpop.permute.xlu2 %1183  ;;  %v1736_v48 = vsel %vm1734_vm5, %v1703_v36, %v3357_v9  ;;  %v4264_v9 = vld [vmem:[#allocation6_spill] sm:$0xff] }
 0x247   : > { %v3515_v54 = vsel %vm1734_vm5, %v3346_v17, %v1184_v63  ;;  %v1164_v23 = vpop.permute.xlu1 %1163  ;;  %v4261_v17 = vld [vmem:[#allocation23_spill] sm:$0xff]  ;;  %v1607_v16 = vsel %vm169_vm0, %v4265_v14, %v4264_v9  ;;  %v527_v63 = vld [vmem:[#allocation2 + $0xc1] sm:$0xff] }
 0x248   : > { %v3520_v60 = vsel %vm1734_vm5, %v1722_v15, %v1164_v23  ;;  %v1168_v52 = vpop.permute.xlu0 %1167  ;;  %v1626_v27 = vsel %vm169_vm0, %v4262_v56, %v4261_v17  ;;  %v4267_v15 = vld [vmem:[#allocation28_spill] sm:$0xff]  ;;  %v4268_v23 = vld [vmem:[#allocation85_spill] sm:$0xff] }
 0x249   : > { %v3523_v55 = vsel %vm1734_vm5, %v1724_v45, %v1168_v52  ;;  %v1659_v47 = vsel %vm1635_vm2, %v1626_v27, %v3014_v31  ;;  %v1629_v45 = vsel %vm169_vm0, %v4268_v23, %v4267_v15  ;;  %v4269_v17 = vld [vmem:[#allocation17_spill] sm:$0xff]  ;;  %v4270_v56 = vld [vmem:[#allocation72_spill] sm:$0xff]  ;;  %v558_v15 = vld [vmem:[#allocation2 + $0xb2] sm:$0xff] }
 0x24a   : > { %v1692_v38 = vsel %vm1668_vm3, %v1659_v47, %v3140_v35  ;;  %v4272_v47 = vld [vmem:[#allocation89_spill] sm:$0xff]  ;;  %v4278_v23 = vld [vmem:[#allocation20_spill] sm:$0xff] }
 0x24b   : > { %v1632_v36 = vsel %vm169_vm0, %v4272_v47, %v4271_v39  ;;  %v4276_v14 = vld [vmem:[#allocation105_spill] sm:$0xff]  ;;  %v4287_v47 = vld [vmem:[#allocation114_spill] sm:$0xff] }
 0x24c   : > { %1565 = vrot.lane.b32.xlu2 %v3252_v0, %s2267_s9  ;;  %v1725_v0 = vsel %vm1701_vm4, %v1692_v38, %v3232_v37  ;;  %v1640_v37 = vsel %vm1635_vm2, %v1607_v16, %v4266_v7  ;;  %v4277_v16 = vld [vmem:[#allocation26_spill] sm:$0xff] }
 0x24d   : > { %1533 = vrot.lane.b32.xlu1 %v560_v33, %s2267_s9  ;;  %v1673_v52 = vsel %vm1668_vm3, %v1640_v37, %v3024_v4 }
 0x24e   : > { %1307 = vrot.lane.b32.xlu0 %v4263_v32, %s2265_s7  ;;  %v1254_v30 = vpop.permute.xlu2 %1253  ;;  %v1706_v34 = vsel %vm1701_vm4, %v1673_v52, %v3198_v20  ;;  %v542_v52 = vld [vmem:[#allocation2 + $0x171] sm:$0xff] }
 0x24f   : > { %v3550_v31 = vsel %vm1767_vm6, %v1736_v48, %v1254_v30  ;;  %v1170_v6 = vpop.permute.xlu1 %1169  ;;  %v1739_v33 = vsel %vm1734_vm5, %v1706_v34, %v3368_v2  ;;  %v1610_v2 = vsel %vm169_vm0, %v4215_v50, %v4269_v17  ;;  %v4273_v48 = vld [vmem:[#allocation90_spill] sm:$0xff]  ;;  %v1665_v50 = vsel %vm1635_vm2, %v1632_v36, %v3038_v21 }
 0x250   : > { %v3553_v13 = vsel %vm1734_vm5, %v1725_v0, %v1170_v6  ;;  %v1174_v18 = vpop.permute.xlu0 %1173  ;;  %v1643_v27 = vsel %vm1635_vm2, %v1610_v2, %v4270_v56  ;;  %v4284_v2 = vld [vmem:[#allocation95_spill] sm:$0xff] }
 0x251   : > { %v3557_v35 = vsel %vm1734_vm5, %v3316_v61, %v1174_v18  ;;  %v1662_v61 = vsel %vm1635_vm2, %v1629_v45, %v3026_v5  ;;  %v1676_v38 = vsel %vm1668_vm3, %v1643_v27, %v3036_v19  ;;  %v4275_v19 = vld [vmem:[#allocation108_spill] sm:$0xff]  ;;  %v1613_v45 = vsel %vm169_vm0, %v4222_v42, %v4278_v23  ;;  %v4285_v42 = vld [vmem:[#allocation65_spill] sm:$0xff] }
 0x252   : > { %v1695_v51 = vsel %vm1668_vm3, %v1662_v61, %v3152_v1  ;;  %v1709_v30 = vsel %vm1701_vm4, %v1676_v38, %v3210_v29  ;;  %v1698_v6 = vsel %vm1668_vm3, %v1665_v50, %v4275_v19  ;;  %v4279_v61 = vld [vmem:[#allocation8_spill] sm:$0xff]  ;;  %v4288_v38 = vld [vmem:[#allocation97_spill] sm:$0xff] }
 0x253   : > { %v1742_v18 = vsel %vm1734_vm5, %v1709_v30, %v3389_v49  ;;  %v1731_v29 = vsel %vm1701_vm4, %v1698_v6, %v4277_v16  ;;  %v4291_v6 = vld [vmem:[#allocation32_spill] sm:$0xff] }
 0x254   : > { %1435 = vrot.lane.b32.xlu2 %v3114_v57, %s2266_s8  ;;  %v1728_v57 = vsel %vm1701_vm4, %v1695_v51, %v3244_v12  ;;  %v526_v12 = vld [vmem:[#allocation2 + $0xb1] sm:$0xff] }
 0x255   : > { %1403 = vrot.lane.b32.xlu1 %v527_v63, %s2266_s8  ;;  %v4280_v51 = vld [vmem:[#allocation78_spill] sm:$0xff] }
 0x256   : > { %1531 = vrot.lane.b32.xlu0 %v559_v58, %s2267_s9  ;;  %v1260_v4 = vpop.permute.xlu2 %1259 }
 0x257   : > { %v3584_v62 = vsel %vm1767_vm6, %v1739_v33, %v1260_v4  ;;  %v1176_v5 = vpop.permute.xlu1 %1175  ;;  %v1646_v33 = vsel %vm1635_vm2, %v1613_v45, %v4280_v51  ;;  %v4281_v4 = vld [vmem:[#allocation10_spill] sm:$0xff]  ;;  %v4294_v45 = vld [vmem:[#allocation71_spill] sm:$0xff] }
 0x258   : > { %v3587_v20 = vsel %vm1734_vm5, %v1728_v57, %v1176_v5  ;;  %v1180_v41 = vpop.permute.xlu0 %1179  ;;  %v4282_v57 = vld [vmem:[#allocation38_spill] sm:$0xff]  ;;  %v1679_v56 = vsel %vm1668_vm3, %v1646_v33, %v4284_v2  ;;  %v4296_v51 = vld [vmem:[#allocation107_spill] sm:$0xff] }
 0x259   : > { %v3591_v1 = vsel %vm1734_vm5, %v3343_v43, %v1180_v41  ;;  %v4274_v43 = vld [vmem:[#allocation59_spill] sm:$0xff]  ;;  %v1605_v5 = vsel %vm169_vm0, %v4282_v57, %v4281_v4  ;;  %v4283_v41 = vld [vmem:[#allocation40_spill] sm:$0xff]  ;;  %v1712_v36 = vsel %vm1701_vm4, %v1679_v56, %v4287_v47  ;;  %v4297_v4 = vld [vmem:[#allocation37_spill] sm:$0xff] }
 0x25a   : > { %v1634_v32 = vsel %vm169_vm0, %v4273_v48, %v4274_v43  ;;  %v1638_v27 = vsel %vm1635_vm2, %v1605_v5, %v4285_v42  ;;  %v4289_v43 = vld [vmem:[#allocation110_spill] sm:$0xff]  ;;  %v1745_v50 = vsel %vm1734_vm5, %v1712_v36, %v3409_v11  ;;  %v4298_v5 = vld [vmem:[#allocation27_spill] sm:$0xff]  ;;  %v4301_v36 = vld [vmem:[#allocation9_spill] sm:$0xff] }
 0x25b   : > { %v1667_v0 = vsel %vm1635_vm2, %v1634_v32, %v3040_v26  ;;  %v290_v26 = vld [vmem:[#allocation2] sm:$0xff]  ;;  %v573_v56 = vld [vmem:[#allocation2 + $0x16a] sm:$0xff]  ;;  %v508_v47 = vld [vmem:[#allocation2 + $0x158] sm:$0xff] }
 0x25c   : > { %1305 = vrot.lane.b32.xlu2 %v4273_v48, %s2265_s7  ;;  %v1700_v21 = vsel %vm1668_vm3, %v1667_v0, %v4276_v14  ;;  %v1603_v34 = vsel %vm169_vm0, %v290_v26, %v4279_v61  ;;  %v1671_v48 = vsel %vm1668_vm3, %v1638_v27, %v4288_v38  ;;  %v4290_v0 = vld [vmem:[#allocation106_spill] sm:$0xff]  ;;  %v509_v26 = vld [vmem:[#allocation2 + $0x168] sm:$0xff]  ;;  %v4299_v27 = vld [vmem:[#allocation15_spill] sm:$0xff] }
 0x25d   : > { %1563 = vrot.lane.b32.xlu1 %v3250_v25, %s2267_s9  ;;  %v1733_v7 = vsel %vm1701_vm4, %v1700_v21, %v3355_v44  ;;  %v574_v44 = vld [vmem:[#allocation2 + $0x172] sm:$0xff]  ;;  %v1636_v17 = vsel %vm1635_vm2, %v1603_v34, %v4283_v41  ;;  %v1704_v19 = vsel %vm1701_vm4, %v1671_v48, %v4290_v0  ;;  %v557_v42 = vld [vmem:[#allocation2 + $0xaa] sm:$0xff]  ;;  %v4305_v0 = vld [vmem:[#allocation100_spill] sm:$0xff] }
 0x25e   : > { %1401 = vrot.lane.b32.xlu0 %v526_v12, %s2266_s8  ;;  %v1266_v9 = vpop.permute.xlu2 %1265  ;;  %v4286_v12 = vld [vmem:[#allocation96_spill] sm:$0xff]  ;;  %v1737_v21 = vsel %vm1734_vm5, %v1704_v19, %v3366_v28  ;;  %v4295_v28 = vld [vmem:[#allocation99_spill] sm:$0xff]  ;;  %v4302_v38 = vld [vmem:[#allocation50_spill] sm:$0xff] }
 0x25f   : > { %v3626_v25 = vsel %vm1767_vm6, %v1742_v18, %v1266_v9  ;;  %v1182_v63 = vpop.permute.xlu1 %1181  ;;  %v1669_v39 = vsel %vm1668_vm3, %v1636_v17, %v4286_v12  ;;  %v4300_v12 = vld [vmem:[#allocation43_spill] sm:$0xff]  ;;  %v1611_v48 = vsel %vm169_vm0, %v4302_v38, %v4301_v36 }
 0x260   : > { %v3631_v37 = vsel %vm1734_vm5, %v1731_v29, %v1182_v63  ;;  %v1186_v49 = vpop.permute.xlu0 %1185  ;;  %v1702_v32 = vsel %vm1701_vm4, %v1669_v39, %v4289_v43  ;;  %v525_v63 = vld [vmem:[#allocation2 + $0xa9] sm:$0xff]  ;;  %v1609_v39 = vsel %vm169_vm0, %v4300_v12, %v4299_v27  ;;  %v4303_v43 = vld [vmem:[#allocation52_spill] sm:$0xff]  ;;  %v4316_v36 = vld [vmem:[#allocation103_spill] sm:$0xff] }
 0x261   : > { %v3634_v58 = vsel %vm1734_vm5, %v1733_v7, %v1186_v49  ;;  %v1735_v18 = vsel %vm1734_vm5, %v1702_v32, %v4291_v6  ;;  %v541_v7 = vld [vmem:[#allocation2 + $0x169] sm:$0xff]  ;;  %v4292_v49 = vld [vmem:[#allocation7_spill] sm:$0xff]  ;;  %v1642_v32 = vsel %vm1635_vm2, %v1609_v39, %v4303_v43 }
 0x262   : > { %v1675_v19 = vsel %vm1668_vm3, %v1642_v32, %v4305_v0  ;;  %v4306_v6 = vld [vmem:[#allocation101_spill] sm:$0xff]  ;;  %v4314_v27 = vld [vmem:[#allocation82_spill] sm:$0xff] }
 0x263   : > { %v4315_v39 = vld [vmem:[#allocation102_spill] sm:$0xff]  ;;  %v4319_v0 = vld [vmem:[#allocation33_spill] sm:$0xff] }
 0x264   : > { %1529 = vrot.lane.b32.xlu2 %v558_v15, %s2267_s9  ;;  %v4293_v15 = vld [vmem:[#allocation44_spill] sm:$0xff] }
 0x265   : > { %1433 = vrot.lane.b32.xlu1 %v542_v52, %s2266_s8  ;;  %v1608_v23 = vsel %vm169_vm0, %v4293_v15, %v4292_v49 }
 0x266   : > { %1561 = vrot.lane.b32.xlu0 %v574_v44, %s2267_s9  ;;  %v1272_v30 = vpop.permute.xlu2 %1271  ;;  %v1641_v52 = vsel %vm1635_vm2, %v1608_v23, %v4294_v45 }
 0x267   : > { %v3670_v9 = vsel %vm1767_vm6, %v1745_v50, %v1272_v30  ;;  %v1252_v14 = vpop.permute.xlu1 %1251  ;;  %v1674_v61 = vsel %vm1668_vm3, %v1641_v52, %v4295_v28  ;;  %v4304_v50 = vld [vmem:[#allocation77_spill] sm:$0xff] }
 0x268   : > { %v3675_v16 = vsel %vm1767_vm6, %v1735_v18, %v1252_v14  ;;  %v1256_v11 = vpop.permute.xlu0 %1255  ;;  %v1707_v33 = vsel %vm1701_vm4, %v1674_v61, %v4296_v51  ;;  %v1644_v30 = vsel %vm1635_vm2, %v1611_v48, %v4304_v50  ;;  %v4307_v14 = vld [vmem:[#allocation112_spill] sm:$0xff]  ;;  %v4317_v48 = vld [vmem:[#allocation113_spill] sm:$0xff]  ;;  %v4318_v50 = vld [vmem:[#allocation111_spill] sm:$0xff] }
 0x269   : > { %v3678_v29 = vsel %vm1767_vm6, %v1737_v21, %v1256_v11  ;;  %v1740_v57 = vsel %vm1734_vm5, %v1707_v33, %v4297_v4  ;;  %v1677_v18 = vsel %vm1668_vm3, %v1644_v30, %v4306_v6  ;;  %v1708_v21 = vsel %vm1701_vm4, %v1675_v19, %v4307_v14  ;;  %v540_v51 = vld [vmem:[#allocation2 + $0x159] sm:$0xff]  ;;  %v4310_v4 = vld [vmem:[#allocation18_spill] sm:$0xff] }
 0x26a   : > { %v524_v33 = vld [vmem:[#allocation2 + $0x99] sm:$0xff] }
 0x26c   : > { %1399 = vrot.lane.b32.xlu2 %v525_v63, %s2266_s8  ;;  %v4308_v63 = vld [vmem:[#allocation109_spill] sm:$0xff] }
 0x26d   : > { %1303 = vrot.lane.b32.xlu1 %v509_v26, %s2265_s7  ;;  %v1710_v26 = vsel %vm1701_vm4, %v1677_v18, %v4308_v63 }
 0x26e   : > { %1431 = vrot.lane.b32.xlu0 %v541_v7, %s2266_s8  ;;  %v3690_v34 = vpop.permute.xlu2 %1277  ;;  %v4309_v7 = vld [vmem:[#allocation31_spill] sm:$0xff]  ;;  %v1743_v45 = vsel %vm1734_vm5, %v1710_v26, %v3407_v22  ;;  %v507_v26 = vld [vmem:[#allocation2 + $0x150] sm:$0xff] }
 0x26f   : > { %v1258_v44 = vpop.permute.xlu1 %1257  ;;  %v1741_v49 = vsel %vm1734_vm5, %v1708_v21, %v4309_v7  ;;  %v572_v7 = vld [vmem:[#allocation2 + $0x15a] sm:$0xff] }
 0x270   : > { %v3698_v41 = vsel %vm1767_vm6, %v4298_v5, %v1258_v44  ;;  %v1262_v17 = vpop.permute.xlu0 %1261  ;;  %v2192_v44 = vld [vmem:[#allocation2 + $0x68] sm:$0xff]  ;;  %v556_v5 = vld [vmem:[#allocation2 + $0x9a] sm:$0xff] }
 0x271   : > { %v3701_v2 = vsel %vm1767_vm6, %v1740_v57, %v1262_v17  ;;  %v1612_v57 = vsel %vm169_vm0, %v2192_v44, %v4310_v4  ;;  %v4312_v17 = vld [vmem:[#allocation56_spill] sm:$0xff] }
 0x274   : > { %1559 = vrot.lane.b32.xlu2 %v573_v56, %s2267_s9 }
 0x275   : > { %1527 = vrot.lane.b32.xlu1 %v557_v42, %s2267_s9  ;;  %v4313_v42 = vld [vmem:[#allocation58_spill] sm:$0xff] }
 0x276   : > { %1301 = vrot.lane.b32.xlu0 %v508_v47, %s2265_s7  ;;  %v1284_v11 = vpop.permute.xlu2 %1283  ;;  %v1645_v22 = vsel %vm1635_vm2, %v1612_v57, %v4313_v42 }
 0x277   : > { %v3728_v15 = vsel %vm1767_vm6, %v3459_v59, %v1284_v11  ;;  %v1264_v23 = vpop.permute.xlu1 %1263  ;;  %v4311_v59 = vld [vmem:[#allocation11_spill] sm:$0xff]  ;;  %v1678_v47 = vsel %vm1668_vm3, %v1645_v22, %v4315_v39  ;;  %v554_v39 = vld [vmem:[#allocation2 + $0x82] sm:$0xff] }
 0x278   : > { %v3733_v52 = vsel %vm1767_vm6, %v1741_v49, %v1264_v23  ;;  %v1268_v28 = vpop.permute.xlu0 %1267  ;;  %v1614_v56 = vsel %vm169_vm0, %v4312_v17, %v4311_v59  ;;  %v1711_v43 = vsel %vm1701_vm4, %v1678_v47, %v4317_v48  ;;  %v523_v49 = vld [vmem:[#allocation2 + $0x91] sm:$0xff]  ;;  %v506_v59 = vld [vmem:[#allocation2 + $0x140] sm:$0xff] }
 0x279   : > { %v3736_v61 = vsel %vm1767_vm6, %v1743_v45, %v1268_v28  ;;  %v1647_v12 = vsel %vm1635_vm2, %v1614_v56, %v4314_v27  ;;  %v1744_v19 = vsel %vm1734_vm5, %v1711_v43, %v4319_v0  ;;  %v555_v45 = vld [vmem:[#allocation2 + $0x92] sm:$0xff]  ;;  %v538_v17 = vld [vmem:[#allocation2 + $0x141] sm:$0xff] }
 0x27a   : > { %v1680_v38 = vsel %vm1668_vm3, %v1647_v12, %v4316_v36  ;;  %v539_v28 = vld [vmem:[#allocation2 + $0x151] sm:$0xff]  ;;  %v570_v12 = vld [vmem:[#allocation2 + $0x142] sm:$0xff]  ;;  %v553_v0 = vld [vmem:[#allocation2 + $0x7a] sm:$0xff] }
 0x27b   : > { %v1713_v30 = vsel %vm1701_vm4, %v1680_v38, %v4318_v50  ;;  %v4320_v36 = vld [vmem:[#allocation14_spill] sm:$0xff]  ;;  %v537_v50 = vld [vmem:[#allocation2 + $0x139] sm:$0xff] }
 0x27c   : > { %1429 = vrot.lane.b32.xlu2 %v540_v51, %s2266_s8  ;;  %v1746_v14 = vsel %vm1734_vm5, %v1713_v30, %v3426_v3  ;;  %v571_v51 = vld [vmem:[#allocation2 + $0x152] sm:$0xff] }
 0x27d   : > { %1397 = vrot.lane.b32.xlu1 %v524_v33, %s2266_s8  ;;  %v521_v30 = vld [vmem:[#allocation2 + $0x79] sm:$0xff] }
 0x27e   : > { %1525 = vrot.lane.b32.xlu0 %v556_v5, %s2267_s9  ;;  %v1290_v32 = vpop.permute.xlu2 %1289  ;;  %v522_v5 = vld [vmem:[#allocation2 + $0x81] sm:$0xff] }
 0x27f   : > { %v3762_v6 = vsel %vm1767_vm6, %v3490_v40, %v1290_v32  ;;  %v1270_v18 = vpop.permute.xlu1 %1269 }
 0x280   : > { %v3767_v21 = vsel %vm1767_vm6, %v1744_v19, %v1270_v18  ;;  %v1274_v11 = vpop.permute.xlu0 %1273 }
 0x281   : > { %v3770_v63 = vsel %vm1767_vm6, %v1746_v14, %v1274_v11 }
 0x284   : > { %1299 = vrot.lane.b32.xlu2 %v507_v26, %s2265_s7 }
 0x285   : > { %1557 = vrot.lane.b32.xlu1 %v572_v7, %s2267_s9 }
 0x286   : > { %1395 = vrot.lane.b32.xlu0 %v523_v49, %s2266_s8  ;;  %v1442_v40 = vpop.permute.xlu2 %1441 }
 0x287   : > { %v3775_v23 = vpop.permute.xlu1 %1275 }
 0x288   : > { %v1280_v3 = vpop.permute.xlu0 %1279 }
 0x289   : > { %v1782_v26 = vsel %vm1767_vm6, %v3456_v46, %v1280_v3 }
 0x28c   : > { %1523 = vrot.lane.b32.xlu2 %v555_v45, %s2267_s9 }
 0x28d   : > { %1427 = vrot.lane.b32.xlu1 %v539_v28, %s2266_s8 }
 0x28e   : > { %1555 = vrot.lane.b32.xlu0 %v571_v51, %s2267_s9  ;;  %v1312_v33 = vpop.permute.xlu2 %1311  ;;  %v569_v51 = vld [vmem:[#allocation2 + $0x13a] sm:$0xff] }
 0x28f   : > { %v1282_v44 = vpop.permute.xlu1 %1281 }
 0x290   : > { %v1286_v4 = vpop.permute.xlu0 %1285  ;;  %v1783_v38 = vsel %vm1767_vm6, %v4320_v36, %v1282_v44  ;;  %v520_v44 = vld [vmem:[#allocation2 + $0x69] sm:$0xff] }
 0x291   : > { %v3782_v57 = vsel %vm1767_vm6, %v3487_v24, %v1286_v4  ;;  %v505_v24 = vld [vmem:[#allocation2 + $0x138] sm:$0xff] }
 0x294   : > { %1393 = vrot.lane.b32.xlu2 %v522_v5, %s2266_s8 }
 0x295   : > { %1297 = vrot.lane.b32.xlu1 %v506_v59, %s2265_s7 }
 0x296   : > { %1425 = vrot.lane.b32.xlu0 %v538_v17, %s2266_s8  ;;  %v1536_v56 = vpop.permute.xlu2 %1535  ;;  %v552_v17 = vld [vmem:[#allocation2 + $0x6a] sm:$0xff] }
 0x297   : > { %v1288_v42 = vpop.permute.xlu1 %1287 }
 0x298   : > { %v3789_v22 = vsel %vm1767_vm6, %v3405_v8, %v1288_v42  ;;  %v1314_v27 = vpop.permute.xlu0 %1313  ;;  %v568_v42 = vld [vmem:[#allocation2 + $0x12a] sm:$0xff] }
 0x299   : > { %v1799_v19 = vsel %vm1767_vm6, %v3634_v58, %v1314_v27  ;;  %v504_v58 = vld [vmem:[#allocation2 + $0x128] sm:$0xff] }
 0x29a   : > { %v1832_v11 = vsel %vm1800_vm8, %v1799_v19, %v1442_v40  ;;  %v1798_v40 = vsel %vm1767_vm6, %v3515_v54, %v1312_v33  ;;  %v4324_v19 = vld [vmem:[#allocation22_spill] sm:$0xff] }
 0x29c   : > { %1553 = vrot.lane.b32.xlu2 %v570_v12, %s2267_s9 }
 0x29d   : > { %1521 = vrot.lane.b32.xlu1 %v554_v39, %s2267_s9  ;;  %v2193_v39 = vld [vmem:[#allocation2 + $0x98] sm:$0xff] }
 0x29e   : > { %1295 = vrot.lane.b32.xlu0 %v505_v24, %s2265_s7  ;;  %v3794_v47 = vpop.permute.xlu2 %1405  ;;  %v4321_v24 = vld [vmem:[#allocation24_spill] sm:$0xff] }
 0x29f   : > { %v1410_v48 = vpop.permute.xlu1 %1409  ;;  %v1616_v36 = vsel %vm169_vm0, %v2193_v39, %v4321_v24 }
 0x2a0   : > { %v1816_v8 = vsel %vm1800_vm8, %v1783_v38, %v1410_v48  ;;  %v1538_v43 = vpop.permute.xlu0 %1537  ;;  %v519_v48 = vld [vmem:[#allocation2 + $0x61] sm:$0xff] }
 0x2a1   : > { %v1849_v32 = vsel %vm1833_vm7, %v1816_v8, %v1538_v43  ;;  %v4322_v8 = vld [vmem:[#allocation83_spill] sm:$0xff] }
 0x2a2   : > { %2100 = vmatpush.xpose.msk.msra.mxu0 %vm1873_vm9, %v1849_v32  ;;  %v1649_v43 = vsel %vm1635_vm2, %v1616_v36, %v4322_v8  ;;  %v550_v8 = vld [vmem:[#allocation2 + $0x52] sm:$0xff] }
 0x2a4   : > { %1423 = vrot.lane.b32.xlu2 %v537_v50, %s2266_s8  ;;  %v503_v50 = vld [vmem:[#allocation2 + $0x120] sm:$0xff] }
 0x2a5   : > { %1391 = vrot.lane.b32.xlu1 %v521_v30, %s2266_s8  ;;  %v4323_v30 = vld [vmem:[#allocation98_spill] sm:$0xff] }
 0x2a6   : > { %1519 = vrot.lane.b32.xlu0 %v553_v0, %s2267_s9  ;;  %v1566_v18 = vpop.permute.xlu2 %1565  ;;  %v1682_v0 = vsel %vm1668_vm3, %v1649_v43, %v4323_v30  ;;  %v534_v43 = vld [vmem:[#allocation2 + $0x111] sm:$0xff] }
 0x2a7   : > { %v1570_v14 = vpop.permute.xlu1 %1569 }
 0x2a8   : > { %v1408_v7 = vpop.permute.xlu0 %1407  ;;  %v1865_v49 = vsel %vm1833_vm7, %v1832_v11, %v1570_v14  ;;  %v1715_v14 = vsel %vm1701_vm4, %v1682_v0, %v4324_v19  ;;  %v4325_v11 = vld [vmem:[#allocation47_spill] sm:$0xff] }
 0x2a9   : > { %v1815_v45 = vsel %vm1800_vm8, %v1782_v26, %v1408_v7  ;;  %2117 = vmatpush.xpose.msk.msra.mxu1 %vm1873_vm9, %v1865_v49  ;;  %v1748_v26 = vsel %vm1734_vm5, %v1715_v14, %v4325_v11 }
 0x2aa   : > { %v1848_v28 = vsel %vm1833_vm7, %v1815_v45, %v1536_v56  ;;  %v536_v56 = vld [vmem:[#allocation2 + $0x129] sm:$0xff] }
 0x2ab   : > { %2101 = vmatpush.xpose.msk.msra.mxu0 %vm1873_vm9, %v1848_v28 }
 0x2ac   : > { %1293 = vrot.lane.b32.xlu2 %v504_v58, %s2265_s7 }
 0x2ad   : > { %1551 = vrot.lane.b32.xlu1 %v569_v51, %s2267_s9  ;;  %v567_v51 = vld [vmem:[#allocation2 + $0x122] sm:$0xff] }
 0x2ae   : > { %1389 = vrot.lane.b32.xlu0 %v520_v44, %s2266_s8  ;;  %v3817_v46 = vpop.permute.xlu2 %1435  ;;  %v2194_v44 = vld [vmem:[#allocation2 + $0x90] sm:$0xff] }
 0x2af   : > { %v1440_v3 = vpop.permute.xlu1 %1439 }
 0x2b0   : > { %v1831_v4 = vsel %vm1800_vm8, %v1798_v40, %v1440_v3  ;;  %v1568_v5 = vpop.permute.xlu0 %1567  ;;  %v4326_v40 = vld [vmem:[#allocation21_spill] sm:$0xff] }
 0x2b1   : > { %v1864_v59 = vsel %vm1833_vm7, %v1831_v4, %v1568_v5  ;;  %v1615_v3 = vsel %vm169_vm0, %v2194_v44, %v4326_v40  ;;  %v551_v4 = vld [vmem:[#allocation2 + $0x62] sm:$0xff]  ;;  %v532_v44 = vld [vmem:[#allocation2 + $0xf9] sm:$0xff] }
 0x2b2   : > { %2118 = vmatpush.xpose.msk.msra.mxu1 %vm1873_vm9, %v1864_v59  ;;  %v4327_v5 = vld [vmem:[#allocation64_spill] sm:$0xff]  ;;  %v518_v59 = vld [vmem:[#allocation2 + $0x51] sm:$0xff] }
 0x2b4   : > { %1517 = vrot.lane.b32.xlu2 %v552_v17, %s2267_s9  ;;  %v4328_v17 = vld [vmem:[#allocation104_spill] sm:$0xff] }
 0x2b5   : > { %1421 = vrot.lane.b32.xlu1 %v536_v56, %s2266_s8 }
 0x2b6   : > { %1549 = vrot.lane.b32.xlu0 %v568_v42, %s2267_s9  ;;  %v3827_v27 = vpop.permute.xlu2 %1305 }
 0x2b7   : > { %v1310_v54 = vpop.permute.xlu1 %1309 }
 0x2b8   : > { %v1797_v33 = vsel %vm1767_vm6, %v3631_v37, %v1310_v54  ;;  %v1438_v12 = vpop.permute.xlu0 %1437  ;;  %v535_v37 = vld [vmem:[#allocation2 + $0x121] sm:$0xff]  ;;  %v4330_v54 = vld [vmem:[#allocation42_spill] sm:$0xff] }
 0x2b9   : > { %v1830_v38 = vsel %vm1800_vm8, %v1797_v33, %v1438_v12 }
 0x2ba   : > { %v1863_v32 = vsel %vm1833_vm7, %v1830_v38, %v1566_v18  ;;  %v1781_v18 = vsel %vm1767_vm6, %v1748_v26, %v3690_v34  ;;  %v1648_v34 = vsel %vm1635_vm2, %v1615_v3, %v4327_v5  ;;  %v517_v26 = vld [vmem:[#allocation2 + $0x49] sm:$0xff]  ;;  %v564_v5 = vld [vmem:[#allocation2 + $0xfa] sm:$0xff] }
 0x2bb   : > { %2119 = vmatpush.xpose.msk.msra.mxu1 %vm1873_vm9, %v1863_v32  ;;  %v1814_v49 = vsel %vm1800_vm8, %v1781_v18, %v3794_v47  ;;  %v1681_v56 = vsel %vm1668_vm3, %v1648_v34, %v4328_v17  ;;  %v4329_v47 = vld [vmem:[#allocation115_spill] sm:$0xff]  ;;  %v549_v18 = vld [vmem:[#allocation2 + $0x4a] sm:$0xff] }
 0x2bc   : > { %1387 = vrot.lane.b32.xlu2 %v519_v48, %s2266_s8  ;;  %v1714_v42 = vsel %vm1701_vm4, %v1681_v56, %v4329_v47  ;;  %v566_v32 = vld [vmem:[#allocation2 + $0x112] sm:$0xff] }
 0x2bd   : > { %1291 = vrot.lane.b32.xlu1 %v503_v50, %s2265_s7  ;;  %v1747_v33 = vsel %vm1734_vm5, %v1714_v42, %v4330_v54  ;;  %v515_v17 = vld [vmem:[#allocation2 + $0x31] sm:$0xff] }
 0x2be   : > { %1419 = vrot.lane.b32.xlu0 %v535_v37, %s2266_s8  ;;  %v1530_v7 = vpop.permute.xlu2 %1529  ;;  %v1780_v39 = vsel %vm1767_vm6, %v1747_v33, %v3775_v23  ;;  %v547_v33 = vld [vmem:[#allocation2 + $0x32] sm:$0xff] }
 0x2bf   : > { %v1534_v45 = vpop.permute.xlu1 %1533 }
 0x2c0   : > { %v1308_v58 = vpop.permute.xlu0 %1307  ;;  %v1847_v28 = vsel %vm1833_vm7, %v1814_v49, %v1534_v45 }
 0x2c1   : > { %2102 = vmatpush.xpose.msk.msra.mxu0 %vm1873_vm9, %v1847_v28  ;;  %v1796_v50 = vsel %vm1767_vm6, %v3591_v1, %v1308_v58  ;;  %v533_v1 = vld [vmem:[#allocation2 + $0x109] sm:$0xff]  ;;  %v516_v28 = vld [vmem:[#allocation2 + $0x39] sm:$0xff] }
 0x2c2   : > { %v1829_v0 = vsel %vm1800_vm8, %v1796_v50, %v3817_v46 }
 0x2c4   : > { %1547 = vrot.lane.b32.xlu2 %v567_v51, %s2267_s9  ;;  %v565_v51 = vld [vmem:[#allocation2 + $0x10a] sm:$0xff] }
 0x2c5   : > { %1515 = vrot.lane.b32.xlu1 %v551_v4, %s2267_s9 }
 0x2c6   : > { %1385 = vrot.lane.b32.xlu0 %v518_v59, %s2266_s8  ;;  %v1400_v12 = vpop.permute.xlu2 %1399  ;;  %v548_v59 = vld [vmem:[#allocation2 + $0x3a] sm:$0xff] }
 0x2c7   : > { %v1404_v24 = vpop.permute.xlu1 %1403 }
 0x2c8   : > { %v1813_v36 = vsel %vm1800_vm8, %v1780_v39, %v1404_v24  ;;  %v1532_v38 = vpop.permute.xlu0 %1531  ;;  %v531_v39 = vld [vmem:[#allocation2 + $0xf1] sm:$0xff] }
 0x2c9   : > { %v1846_v48 = vsel %vm1833_vm7, %v1813_v36, %v1532_v38  ;;  %v563_v24 = vld [vmem:[#allocation2 + $0xf2] sm:$0xff] }
 0x2ca   : > { %2103 = vmatpush.xpose.msk.msra.mxu0 %vm1873_vm9, %v1846_v48 }
 0x2cc   : > { %1513 = vrot.lane.b32.xlu2 %v550_v8, %s2267_s9 }
 0x2cd   : > { %1417 = vrot.lane.b32.xlu1 %v534_v43, %s2266_s8 }
 0x2ce   : > { %1545 = vrot.lane.b32.xlu0 %v566_v32, %s2267_s9  ;;  %v1560_v23 = vpop.permute.xlu2 %1559 }
 0x2cf   : > { %v1564_v30 = vpop.permute.xlu1 %1563 }
 0x2d0   : > { %v1402_v37 = vpop.permute.xlu0 %1401  ;;  %v1862_v19 = vsel %vm1833_vm7, %v1829_v0, %v1564_v30 }
 0x2d1   : > { %v1812_v14 = vsel %vm1800_vm8, %v3770_v63, %v1402_v37  ;;  %2120 = vmatpush.xpose.msk.msra.mxu1 %vm1873_vm9, %v1862_v19  ;;  %v1795_v63 = vsel %vm1767_vm6, %v3482_v53, %v3827_v27 }
 0x2d2   : > { %v1845_v11 = vsel %vm1833_vm7, %v1812_v14, %v1530_v7 }
 0x2d3   : > { %2104 = vmatpush.xpose.msk.msra.mxu0 %vm1873_vm9, %v1845_v11 }
 0x2d4   : > { %1415 = vrot.lane.b32.xlu2 %v533_v1, %s2266_s8 }
 0x2d5   : > { %1383 = vrot.lane.b32.xlu1 %v517_v26, %s2266_s8 }
 0x2d6   : > { %1511 = vrot.lane.b32.xlu0 %v549_v18, %s2267_s9  ;;  %v1430_v46 = vpop.permute.xlu2 %1429 }
 0x2d7   : > { %v1434_v49 = vpop.permute.xlu1 %1433 }
 0x2d8   : > { %v1828_v45 = vsel %vm1800_vm8, %v1795_v63, %v1434_v49  ;;  %v1562_v58 = vpop.permute.xlu0 %1561 }
 0x2d9   : > { %v1861_v7 = vsel %vm1833_vm7, %v1828_v45, %v1562_v58 }
 0x2da   : > { %2121 = vmatpush.xpose.msk.msra.mxu1 %vm1873_vm9, %v1861_v7 }
 0x2dc   : > { %1381 = vrot.lane.b32.xlu2 %v516_v28, %s2266_s8 }
 0x2dd   : > { %1543 = vrot.lane.b32.xlu1 %v565_v51, %s2267_s9 }
 0x2de   : > { %1413 = vrot.lane.b32.xlu0 %v532_v44, %s2266_s8  ;;  %v1300_v40 = vpop.permute.xlu2 %1299 }
 0x2df   : > { %v1304_v3 = vpop.permute.xlu1 %1303  ;;  %v1792_v37 = vsel %vm1767_vm6, %v3451_v10, %v1300_v40 }
 0x2e0   : > { %v1794_v53 = vsel %vm1767_vm6, %v3587_v20, %v1304_v3  ;;  %v1432_v27 = vpop.permute.xlu0 %1431  ;;  %v1811_v20 = vsel %vm1800_vm8, %v3670_v9, %v1400_v12 }
 0x2e1   : > { %v1827_v4 = vsel %vm1800_vm8, %v1794_v53, %v1432_v27 }
 0x2e2   : > { %v1860_v34 = vsel %vm1833_vm7, %v1827_v4, %v1560_v23 }
 0x2e3   : > { %2122 = vmatpush.xpose.msk.msra.mxu1 %vm1873_vm9, %v1860_v34 }
 0x2e4   : > { %1541 = vrot.lane.b32.xlu2 %v564_v5, %s2267_s9 }
 0x2e5   : > { %1509 = vrot.lane.b32.xlu1 %v548_v59, %s2267_s9  ;;  %v4331_v59 = vld [vmem:[#allocation46_spill] sm:$0xff] }
 0x2e6   : > { %1379 = vrot.lane.b32.xlu0 %v515_v17, %s2266_s8  ;;  %v1524_v56 = vpop.permute.xlu2 %1523 }
 0x2e7   : > { %v1528_v47 = vpop.permute.xlu1 %1527 }
 0x2e8   : > { %v1302_v42 = vpop.permute.xlu0 %1301  ;;  %v1844_v54 = vsel %vm1833_vm7, %v1811_v20, %v1528_v47 }
 0x2e9   : > { %2105 = vmatpush.xpose.msk.msra.mxu0 %vm1873_vm9, %v1844_v54  ;;  %v1793_v8 = vsel %vm1767_vm6, %v3557_v35, %v1302_v42 }
 0x2ea   : > { %v1826_v50 = vsel %vm1800_vm8, %v1793_v8, %v1430_v46 }
 0x2ec   : > { %1507 = vrot.lane.b32.xlu2 %v547_v33, %s2267_s9 }
 0x2ed   : > { %1411 = vrot.lane.b32.xlu1 %v531_v39, %s2266_s8 }
 0x2ee   : > { %1539 = vrot.lane.b32.xlu0 %v563_v24, %s2267_s9  ;;  %v1394_v36 = vpop.permute.xlu2 %1393  ;;  %s2215_s9 = scalar_lea.hbm %s4040_s3, 32 }
 0x2ef   : > { %v1398_v38 = vpop.permute.xlu1 %1397  ;;  %v1808_v10 = vsel %vm1800_vm8, %v3626_v25, %v1394_v36  ;;  %p2217_p1 = scmp.lt.s32.totalorder %s2215_s9, %s2211_s6 }
 0x2f0   : > { %v1810_v9 = vsel %vm1800_vm8, %v3767_v21, %v1398_v38  ;;  %v1526_v12 = vpop.permute.xlu0 %1525 }
 0x2f1   : > { %v1843_v48 = vsel %vm1833_vm7, %v1810_v9, %v1526_v12  ;;  %p2218_p2 = por %p2217_p1, %p2216_p0 }
 0x2f2   : > { %2106 = vmatpush.xpose.msk.msra.mxu0 %vm1873_vm9, %v1843_v48 }
 0x2f3   : > { %p2219_p3 = pnand %p2218_p2, %p2214_p13 }
 0x2f6   : > { %v1554_v43 = vpop.permute.xlu2 %1553 }
 0x2f7   : > { %v1558_v32 = vpop.permute.xlu1 %1557 }
 0x2f8   : > { %v1396_v23 = vpop.permute.xlu0 %1395  ;;  %v1859_v30 = vsel %vm1833_vm7, %v1826_v50, %v1558_v32 }
 0x2f9   : > { %v1809_v0 = vsel %vm1800_vm8, %v3736_v61, %v1396_v23  ;;  %2123 = vmatpush.xpose.msk.msra.mxu1 %vm1873_vm9, %v1859_v30 }
 0x2fa   : > { %v1842_v21 = vsel %vm1833_vm7, %v1809_v0, %v1524_v56  ;;  %v2268_v0 = vmov 0  }
 0x2fb   : > { %2107 = vmatpush.xpose.msk.msra.mxu0 %vm1873_vm9, %v1842_v21  ;;  %2190 = vset.pattern.permute.xlu1 %v2268_v0 }
 0x2fc   : > { %2191 = vset.pattern.permute.xlu0 %v2268_v0 }
 0x2fe   : > { %v1424_v35 = vpop.permute.xlu2 %1423 }
 0x2ff   : > { %v1428_v19 = vpop.permute.xlu1 %1427 }
 0x300   : > { %v1825_v14 = vsel %vm1800_vm8, %v1792_v37, %v1428_v19  ;;  %v1556_v1 = vpop.permute.xlu0 %1555 }
 0x301   : > { %v1858_v11 = vsel %vm1833_vm7, %v1825_v14, %v1556_v1 }
 0x302   : > { %2124 = vmatpush.xpose.msk.msra.mxu1 %vm1873_vm9, %v1858_v11 }
 0x306   : > { %v1294_v46 = vpop.permute.xlu2 %1293 }
 0x307   : > { %v1298_v26 = vpop.permute.xlu1 %1297  ;;  %v1789_v17 = vsel %vm1767_vm6, %v4331_v59, %v1294_v46 }
 0x308   : > { %v1791_v61 = vsel %vm1767_vm6, %v3553_v13, %v1298_v26  ;;  %v1426_v18 = vpop.permute.xlu0 %1425 }
 0x309   : > { %v1824_v63 = vsel %vm1800_vm8, %v1791_v61, %v1426_v18 }
 0x30a   : > { %v1857_v49 = vsel %vm1833_vm7, %v1824_v63, %v1554_v43 }
 0x30b   : > { %2125 = vmatpush.xpose.msk.msra.mxu1 %vm1873_vm9, %v1857_v49 }
 0x30e   : > { %v1518_v28 = vpop.permute.xlu2 %1517 }
 0x30f   : > { %v1522_v45 = vpop.permute.xlu1 %1521 }
 0x310   : > { %v1296_v58 = vpop.permute.xlu0 %1295  ;;  %v1841_v7 = vsel %vm1833_vm7, %v1808_v10, %v1522_v45 }
 0x311   : > { %2108 = vmatpush.xpose.msk.msra.mxu0 %vm1873_vm9, %v1841_v7  ;;  %v1790_v3 = vsel %vm1767_vm6, %v3523_v55, %v1296_v58 }
 0x312   : > { %v1823_v27 = vsel %vm1800_vm8, %v1790_v3, %v1424_v35 }
 0x316   : > { %v1388_v25 = vpop.permute.xlu2 %1387 }
 0x317   : > { %v1392_v51 = vpop.permute.xlu1 %1391  ;;  %v1805_v38 = vsel %vm1800_vm8, %v3584_v62, %v1388_v25 }
 0x318   : > { %v1807_v13 = vsel %vm1800_vm8, %v3733_v52, %v1392_v51  ;;  %v1520_v44 = vpop.permute.xlu0 %1519 }
 0x319   : > { %v1840_v40 = vsel %vm1833_vm7, %v1807_v13, %v1520_v44 }
 0x31a   : > { %2109 = vmatpush.xpose.msk.msra.mxu0 %vm1873_vm9, %v1840_v40 }
 0x31e   : > { %v1548_v55 = vpop.permute.xlu2 %1547 }
 0x31f   : > { %v1552_v53 = vpop.permute.xlu1 %1551 }
 0x320   : > { %v1390_v4 = vpop.permute.xlu0 %1389  ;;  %v1856_v5 = vsel %vm1833_vm7, %v1823_v27, %v1552_v53 }
 0x321   : > { %v1806_v34 = vsel %vm1800_vm8, %v3701_v2, %v1390_v4  ;;  %2126 = vmatpush.xpose.msk.msra.mxu1 %vm1873_vm9, %v1856_v5 }
 0x322   : > { %v1839_v52 = vsel %vm1833_vm7, %v1806_v34, %v1518_v28 }
 0x323   : > { %2110 = vmatpush.xpose.msk.msra.mxu0 %vm1873_vm9, %v1839_v52 }
 0x326   : > { %v1514_v39 = vpop.permute.xlu2 %1513 }
 0x327   : > { %v1422_v56 = vpop.permute.xlu1 %1421 }
 0x328   : > { %v1822_v20 = vsel %vm1800_vm8, %v1789_v17, %v1422_v56  ;;  %v1550_v47 = vpop.permute.xlu0 %1549 }
 0x329   : > { %v1855_v42 = vsel %vm1833_vm7, %v1822_v20, %v1550_v47 }
 0x32a   : > { %2127 = vmatpush.xpose.msk.msra.mxu1 %vm1873_vm9, %v1855_v42 }
 0x32e   : > { %v1416_v43 = vpop.permute.xlu2 %1415 }
 0x32f   : > { %v1292_v54 = vpop.permute.xlu1 %1291  ;;  %v1819_v14 = vsel %vm1800_vm8, %v3789_v22, %v1416_v43 }
 0x330   : > { %v1788_v2 = vsel %vm1767_vm6, %v3520_v60, %v1292_v54  ;;  %v1420_v33 = vpop.permute.xlu0 %1419 }
 0x331   : > { %v1821_v24 = vsel %vm1800_vm8, %v1788_v2, %v1420_v33 }
 0x332   : > { %v1854_v36 = vsel %vm1833_vm7, %v1821_v24, %v1548_v55 }
 0x333   : > { %2128 = vmatpush.xpose.msk.msra.mxu1 %vm1873_vm9, %v1854_v36 }
 0x336   : > { %v1382_v30 = vpop.permute.xlu2 %1381 }
 0x337   : > { %v1516_v9 = vpop.permute.xlu1 %1515  ;;  %v1802_v18 = vsel %vm1800_vm8, %v3550_v31, %v1382_v30  ;;  %v1866_v31 = vld [vmem:[%s4038_s1] sm:$0xff] }
 0x338   : > { %v1386_v12 = vpop.permute.xlu0 %1385  ;;  %v1838_v48 = vsel %vm1833_vm7, %v1805_v38, %v1516_v9 }
 0x339   : > { %v1804_v8 = vsel %vm1800_vm8, %v3698_v41, %v1386_v12  ;;  %2111 = vmatpush.xpose.msk.msra.mxu0 %vm1873_vm9, %v1838_v48  ;;  %v1867_v41 = vld [vmem:[%s4039_s2] sm:$0xff] }
 0x33a   : > { %v1837_v60 = vsel %vm1833_vm7, %v1804_v8, %v1514_v39  ;;  %1870 = vperm.xlu1 %2190, %v1867_v41  }
 0x33d   : > { %2112 = vmatpush.xpose.msk.msra.mxu0 %vm1873_vm9, %v1837_v60 }
 0x33e   : > { %v1542_v19 = vpop.permute.xlu2 %1541 }
 0x33f   : > { %v1418_v32 = vpop.permute.xlu1 %1417 }
 0x340   : > { %v1820_v50 = vsel %vm1800_vm8, %v3762_v6, %v1418_v32  ;;  %v1546_v23 = vpop.permute.xlu0 %1545 }
 0x341   : > { %v1853_v62 = vsel %vm1833_vm7, %v1820_v50, %v1546_v23 }
 0x342   : > { %2129 = vmatpush.xpose.msk.msra.mxu1 %vm1873_vm9, %v1853_v62 }
 0x346   : > { %v1508_v63 = vpop.permute.xlu2 %1507 }
 0x347   : > { %v1384_v21 = vpop.permute.xlu1 %1383 }
 0x348   : > { %v1803_v37 = vsel %vm1800_vm8, %v3678_v29, %v1384_v21  ;;  %v1512_v35 = vpop.permute.xlu0 %1511 }
 0x349   : > { %v1836_v6 = vsel %vm1833_vm7, %v1803_v37, %v1512_v35 }
 0x34a   : > { %2113 = vmatpush.xpose.msk.msra.mxu0 %vm1873_vm9, %v1836_v6 }
 0x34f   : > { %v1544_v1 = vpop.permute.xlu1 %1543 }
 0x350   : > { %v1414_v11 = vpop.permute.xlu0 %1413  ;;  %v1852_v26 = vsel %vm1833_vm7, %v1819_v14, %v1544_v1 }
 0x351   : > { %v1818_v61 = vsel %vm1800_vm8, %v3782_v57, %v1414_v11  ;;  %2130 = vmatpush.xpose.msk.msra.mxu1 %vm1873_vm9, %v1852_v26 }
 0x352   : > { %v1851_v29 = vsel %vm1833_vm7, %v1818_v61, %v1542_v19 }
 0x355   : > { %2131 = vmatpush.xpose.msk.msra.mxu1 %vm1873_vm9, %v1851_v29 }
 0x357   : > { %v1510_v46 = vpop.permute.xlu1 %1509 }
 0x358   : > { %v1380_v22 = vpop.permute.xlu0 %1379  ;;  %v1835_v49 = vsel %vm1833_vm7, %v1802_v18, %v1510_v46 }
 0x359   : > { %v1801_v10 = vsel %vm1800_vm8, %v3675_v16, %v1380_v22  ;;  %2114 = vmatpush.xpose.msk.msra.mxu0 %vm1873_vm9, %v1835_v49 }
 0x35a   : > { %v1834_v57 = vsel %vm1833_vm7, %v1801_v10, %v1508_v63 }
 0x35d   : > { %2115 = vmatpush.xpose.msk.msra.mxu0 %vm1873_vm9, %v1834_v57 }
 0x35f   : > { %v1412_v45 = vpop.permute.xlu1 %1411 }
 0x360   : > { %v1817_v58 = vsel %vm1800_vm8, %v3728_v15, %v1412_v45  ;;  %v1540_v7 = vpop.permute.xlu0 %1539  ;;  %2116 = vmatmul.msk.f32.vlgmr.msra.gmra.mxu0 %vm1873_vm9, %v1866_v31 }
 0x361   : > { %v1850_v28 = vsel %vm1833_vm7, %v1817_v58, %v1540_v7 }
 0x362   : > { %2132 = vmatpush.xpose.msk.msra.mxu1 %vm1873_vm9, %v1850_v28 }
 0x365   : > { %2133 = vmatmul.msk.f32.vlgmr.msra.gmra.mxu1 %vm1873_vm9, %v1866_v31 }
 0x3ac   : > { %v1871_v16 = vpop.permute.xlu1 %1870 }
 0x3dd   : > { %v1990_v51 = vpop.f32.mrf.mxu0 }
 0x3de   : > { %v1991_v13 = vadd.f32 %v1990_v51, %v1871_v16 }
 0x3e0   : > { %v2013_v15 = vmax.f32 %v1991_v13, 0.0 }
 0x3e2   : > { %v2010_v44 = vpop.f32.mrf.mxu1  ;;  %2015 = vst [vmem:[%s163_s29] sm:$0xff] %v2013_v15 }
 0x3e3   : > { %v2011_v40 = vadd.f32 %v2010_v44, %v1871_v16 }
 0x3e5   : > { %v2014_v3 = vmax.f32 %v2011_v40, 0.0 }
 0x3e7   : > { %2016 = vst [vmem:[%s163_s29 + $0x8] sm:$0xff] %v2014_v3 }
 0x3e8   : > { %2222 = shalt.err (!%p2219_p3)
}
 0x3e9   : > { %2141 = dma.vmem_to_hbm [thread:$0]  (%p2327_p5), %s2032_s30, 256, %s2034_s4, %s2018_s5  }
 0x3ea PF: > { %p2147_p4 = scmp.ge.s32.totalorder %s2257_s15, 2  ;;  %s2045_s17 = sand.u32 1, %s2245_s12  }
 0x3eb   : > { %s2046_s19 = scalar_lea.sflag [#allocation4], %s2045_s17 }
 0x3ec   : > { %p2144_p7 = pnand %p2147_p4, %p2331_p6 }
 0x3ee   : > { %p2145_p8 = pneg %p2144_p7 }
 0x3f0   : > { %2240 = dma.done.wait (%p2145_p8), %s2046_s19, 256  }
 0x3f1   : > { %2242 = vsyncadd (%p2145_p8), %s2046_s19, 4294967040  ;;  %p13_p9 = scmp.ge.s32.totalorder %s2314_s18, 4   ;;  %s4332_s12 = smov %s2249_s13 }
 0x3f2   : > { %s4333_s13 = smov %s2253_s14  ;;  %s4334_s14 = smov %s2325_s21 }
 0x3f3   : > { %s4335_s15 = smov %s2314_s18  ;;  %15 = sbr.rel (!%p13_p9) target bundleno = 3 (0x3), region = 69 }
 0x3f8   :  { %2052 = vsyncpa [#allocation4], 1 }
 0x3f9   :  { %2054 = vsyncpa [#allocation4 + $0x1], 1 }

</bundles_post_ra>
